<compile_context>
chip_gen: v5e
topology: v5e:2x2
jax: 0.10.0
libtpu: 0.0.40
codegen_flags: <defaults>
</compile_context>

<pallas_src>
import functools

import jax
import jax.numpy as jnp
import numpy as np
from jax.experimental import pallas as pl
from jax.experimental.pallas import tpu as pltpu


def _fused_conv_pool_kernel(xph_ref, w_ref, b_ref, o_ref, *,
                            TH, Wo, Wo_pad, Wpool, Cin, Cout):
    # xph_ref: (1, 4, Hh, Wh, Cin)   4 = (row-parity, col-parity) phases of the
    #                                padded NHWC input (resident per batch elem)
    # w_ref  : (9, Cin, Cout)        tap index = kh*3 + kw (both convs stacked)
    # b_ref  : (1, Cout)
    # o_ref  : (1, Cout, TH*Wpool)   lane-dense pooled output block
    j = pl.program_id(1)
    r0 = j * TH                       # first conv/pooled row of this block
    M2 = (TH + 1) * Wo_pad            # conv rows incl. pool halo, padded width

    # 9-tap conv accumulation: x_pad[2r+kh, 2w+kw] == phase[(kh%2,kw%2)][r+kh//2, w+kw//2]
    acc = jnp.zeros((M2, Cout), jnp.float32)
    for kh in range(3):
        for kw in range(3):
            ph = (kh % 2) * 2 + (kw % 2)
            slab = xph_ref[0, ph,
                           pl.ds(r0 + kh // 2, TH + 1),
                           pl.ds(kw // 2, Wo_pad), :]          # (TH+1, Wo_pad, Cin)
            acc = acc + jnp.dot(slab.reshape(M2, Cin),
                                w_ref[kh * 3 + kw],
                                preferred_element_type=jnp.float32)
    acc = acc + b_ref[...].astype(jnp.float32)
    conv = acc.reshape(TH + 1, Wo_pad, Cout)                   # f32

    # fused 2x2 / stride-1 max pool (kept in f32)
    mw = jnp.maximum(conv[:, :Wpool, :], conv[:, 1:Wpool + 1, :])
    pooled = jnp.maximum(mw[:TH, :, :], mw[1:TH + 1, :, :])    # (TH, Wpool, Cout)

    # lane-dense store: channels on sublanes, flattened spatial on lanes
    out2d = pooled.reshape(TH * Wpool, Cout).T                 # (Cout, TH*Wpool)
    o_ref[0] = out2d.astype(o_ref.dtype)


def downsample_forward(x_nchw, w1, b1, w2, b2, *, max_th=64):
    """x_nchw: (N, Cin, H, W); w*: (Cout//2, Cin, 3, 3); b*: (Cout//2,)."""
    N, Cin, H, W = x_nchw.shape
    half = w1.shape[0]
    Cout = 2 * half

    Ho = (H + 4 - 3) // 2 + 1
    Wo = (W + 4 - 3) // 2 + 1
    Hpool, Wpool = Ho - 1, Wo - 1

    # ---- wrapper glue (layout plumbing only, ~1x data) -----------------------
    x_nhwc = jnp.transpose(x_nchw, (0, 2, 3, 1))
    xp = jnp.pad(x_nhwc, ((0, 0), (2, 2), (2, 2), (0, 0)))
    Hp, Wp = H + 4, W + 4
    Hh = -(-Hp // 2)                       # ceil(Hp/2)
    Wo_pad = -(-Wo // 8) * 8               # pad slab width to sublane multiple
    Wh = max(-(-Wp // 2), 1 + Wo_pad)      # ensure in-bounds reads of padded slabs
    xp = jnp.pad(xp, ((0, 0), (0, 2 * Hh - Hp), (0, 2 * Wh - Wp), (0, 0)))
    # 4 parity phases: phase[ph*2+pw][n, i, j, c] = xp[n, 2i+ph, 2j+pw, c]
    phases = jnp.stack(
        [xp[:, ph::2, pw::2, :] for ph in (0, 1) for pw in (0, 1)], axis=1
    )                                       # (N, 4, Hh, Wh, Cin)

    # row-block size: output block last dim must be lane-aligned (x128) or full
    if Hpool <= max_th:
        TH = Hpool
    else:
        TH = None
        for th in range(min(max_th, Hpool), 0, -1):
            if Hpool % th == 0 and (th * Wpool) % 128 == 0:
                TH = th
                break
        if TH is None:
            TH = Hpool  # TODO(synk): halo-tiled H streaming for very large images
    n_hblk = Hpool // TH

    # both convs as one weight stack: (9, Cin, Cout), tap = kh*3+kw; conv1 first
    def w_to_taps(w):  # (half, Cin, 3, 3) -> (9, Cin, half)
        return jnp.transpose(w, (2, 3, 1, 0)).reshape(9, Cin, half)

    w_taps = jnp.concatenate([w_to_taps(w1), w_to_taps(w2)], axis=-1)
    b_all = jnp.concatenate([b1, b2]).reshape(1, Cout)

    kernel = functools.partial(
        _fused_conv_pool_kernel,
        TH=TH, Wo=Wo, Wo_pad=Wo_pad, Wpool=Wpool, Cin=Cin, Cout=Cout)

    out_flat = pl.pallas_call(
        kernel,
        out_shape=jax.ShapeDtypeStruct((N, Cout, Hpool * Wpool), x_nchw.dtype),
        grid_spec=pltpu.PrefetchScalarGridSpec(
            num_scalar_prefetch=0,
            grid=(N, n_hblk),
            in_specs=[
                # whole (padded, phase-split) image per batch elem, resident
                # across the row-block axis; double-buffered across batch.
                pl.BlockSpec((1, 4, Hh, Wh, Cin), lambda n, j: (n, 0, 0, 0, 0)),
                # weights / bias: DMA'd once, resident for the whole grid
                pl.BlockSpec((9, Cin, Cout), lambda n, j: (0, 0, 0)),
                pl.BlockSpec((1, Cout), lambda n, j: (0, 0)),
            ],
            out_specs=pl.BlockSpec((1, Cout, TH * Wpool), lambda n, j: (n, 0, j)),
        ),
        compiler_params=pltpu.CompilerParams(
            dimension_semantics=("parallel", "parallel"),
            vmem_limit_bytes=48 * 1024 * 1024,
        ),
    )(phases, w_taps, b_all)

    # free reshape (no transpose): already NCHW with spatial flattened
    return out_flat.reshape(N, Cout, Hpool, Wpool)


def reference_forward(x, w1, b1, w2, b2):
    # Pure-JAX reference of the PyTorch module for verification.
    dn = jax.lax.conv_dimension_numbers(x.shape, w1.shape, ("NCHW", "OIHW", "NCHW"))

    def conv(w, b):
        y = jax.lax.conv_general_dilated(
            x, w, window_strides=(2, 2), padding=[(2, 2), (2, 2)],
            dimension_numbers=dn)
        return y + b.reshape(1, -1, 1, 1)

    def pool(y):
        return jax.lax.reduce_window(
            y, -jnp.inf, jax.lax.max,
            window_dimensions=(1, 1, 2, 2), window_strides=(1, 1, 1, 1),
            padding="VALID")

    return jnp.concatenate([pool(conv(w1, b1)), pool(conv(w2, b2))], axis=1)


if __name__ == "__main__":
    inc, outc = 4, 8
    N, H, W = 2, 16, 16

    key = jax.random.PRNGKey(0)
    kx, kw1, kb1, kw2, kb2 = jax.random.split(key, 5)

    x = jax.random.normal(kx, (N, inc, H, W), dtype=jnp.float32)
    w1 = 0.1 * jax.random.normal(kw1, (outc // 2, inc, 3, 3), dtype=jnp.float32)
    b1 = 0.1 * jax.random.normal(kb1, (outc // 2,), dtype=jnp.float32)
    w2 = 0.1 * jax.random.normal(kw2, (outc // 2, inc, 3, 3), dtype=jnp.float32)
    b2 = 0.1 * jax.random.normal(kb2, (outc // 2,), dtype=jnp.float32)

    out = jax.block_until_ready(downsample_forward(x, w1, b1, w2, b2))
    ref = jax.block_until_ready(reference_forward(x, w1, b1, w2, b2))

    assert out.shape == (N, outc, 8, 8), out.shape
    np.testing.assert_allclose(np.asarray(out), np.asarray(ref), atol=1e-4, rtol=1e-4)

    print("KERNEL_OK")
</pallas_src>

<mosaic_0001>
module attributes {stable_mosaic.version = 11 : i64} {
  func.func @_fused_conv_pool_kernel(%arg0: i32, %arg1: i32, %arg2: memref<1x4x10x17x4xf32, #tpu.memory_space<vmem>>, %arg3: memref<9x4x8xf32, #tpu.memory_space<vmem>>, %arg4: memref<1x8xf32, #tpu.memory_space<vmem>>, %arg5: memref<1x8x64xf32, #tpu.memory_space<vmem>>) attributes {dimension_semantics = [#tpu.dimension_semantics<parallel>, #tpu.dimension_semantics<parallel>], iteration_bounds = array<i64: 2, 1>, scalar_prefetch = 0 : i64, scratch_operands = 0 : i64, tpu.core_type = #tpu.core_type<tc>, window_params = [{transform_indices = @transform_0, window_bounds = array<i64: 1, 4, 10, 17, 4>}, {pipeline_mode = #tpu.pipeline_mode<synchronous>, transform_indices = @transform_1, window_bounds = array<i64: 9, 4, 8>}, {pipeline_mode = #tpu.pipeline_mode<synchronous>, transform_indices = @transform_2, window_bounds = array<i64: 1, 8>}, {transform_indices = @transform_3, window_bounds = array<i64: 1, 8, 64>}]} {
    %c8_i32 = arith.constant 8 : i32
    %0 = arith.muli %arg1, %c8_i32 : i32
    %cst = arith.constant 0.000000e+00 : f32
    %1 = vector.broadcast %cst : f32 to vector<144x8xf32>
    %c0_i32 = arith.constant 0 : i32
    %2 = arith.addi %0, %c0_i32 : i32
    %c0 = arith.constant 0 : index
    %c0_0 = arith.constant 0 : index
    %3 = arith.index_cast %2 : i32 to index
    %c0_1 = arith.constant 0 : index
    %c0_2 = arith.constant 0 : index
    %4 = vector.load %arg2[%c0, %c0_0, %3, %c0_1, %c0_2] : memref<1x4x10x17x4xf32, #tpu.memory_space<vmem>>, vector<1x1x9x16x4xf32>
    %5 = vector.shape_cast %4 : vector<1x1x9x16x4xf32> to vector<9x16x4xf32>
    %6 = vector.shape_cast %5 : vector<9x16x4xf32> to vector<144x4xf32>
    %c0_3 = arith.constant 0 : index
    %c0_4 = arith.constant 0 : index
    %c0_5 = arith.constant 0 : index
    %7 = vector.load %arg3[%c0_3, %c0_4, %c0_5] : memref<9x4x8xf32, #tpu.memory_space<vmem>>, vector<1x4x8xf32>
    %8 = vector.shape_cast %7 : vector<1x4x8xf32> to vector<4x8xf32>
    %cst_6 = arith.constant dense<0.000000e+00> : vector<144x8xf32>
    %9 = tpu.matmul %6, %8, %cst_6 {dimension_numbers = #tpu.dot_dimension_numbers<[1], [0], [0], [1], [0, 0, 1, 1], [], []>} : vector<144x4xf32>, vector<4x8xf32>, vector<144x8xf32> -> vector<144x8xf32>
    %10 = arith.addf %1, %9 : vector<144x8xf32>
    %c0_i32_7 = arith.constant 0 : i32
    %11 = arith.addi %0, %c0_i32_7 : i32
    %c0_8 = arith.constant 0 : index
    %c1 = arith.constant 1 : index
    %12 = arith.index_cast %11 : i32 to index
    %c0_9 = arith.constant 0 : index
    %c0_10 = arith.constant 0 : index
    %13 = vector.load %arg2[%c0_8, %c1, %12, %c0_9, %c0_10] : memref<1x4x10x17x4xf32, #tpu.memory_space<vmem>>, vector<1x1x9x16x4xf32>
    %14 = vector.shape_cast %13 : vector<1x1x9x16x4xf32> to vector<9x16x4xf32>
    %15 = vector.shape_cast %14 : vector<9x16x4xf32> to vector<144x4xf32>
    %c1_11 = arith.constant 1 : index
    %c0_12 = arith.constant 0 : index
    %c0_13 = arith.constant 0 : index
    %16 = vector.load %arg3[%c1_11, %c0_12, %c0_13] : memref<9x4x8xf32, #tpu.memory_space<vmem>>, vector<1x4x8xf32>
    %17 = vector.shape_cast %16 : vector<1x4x8xf32> to vector<4x8xf32>
    %cst_14 = arith.constant dense<0.000000e+00> : vector<144x8xf32>
    %18 = tpu.matmul %15, %17, %cst_14 {dimension_numbers = #tpu.dot_dimension_numbers<[1], [0], [0], [1], [0, 0, 1, 1], [], []>} : vector<144x4xf32>, vector<4x8xf32>, vector<144x8xf32> -> vector<144x8xf32>
    %19 = arith.addf %10, %18 : vector<144x8xf32>
    %c0_i32_15 = arith.constant 0 : i32
    %20 = arith.addi %0, %c0_i32_15 : i32
    %c0_16 = arith.constant 0 : index
    %c0_17 = arith.constant 0 : index
    %21 = arith.index_cast %20 : i32 to index
    %c1_18 = arith.constant 1 : index
    %c0_19 = arith.constant 0 : index
    %22 = vector.load %arg2[%c0_16, %c0_17, %21, %c1_18, %c0_19] : memref<1x4x10x17x4xf32, #tpu.memory_space<vmem>>, vector<1x1x9x16x4xf32>
    %23 = vector.shape_cast %22 : vector<1x1x9x16x4xf32> to vector<9x16x4xf32>
    %24 = vector.shape_cast %23 : vector<9x16x4xf32> to vector<144x4xf32>
    %c2 = arith.constant 2 : index
    %c0_20 = arith.constant 0 : index
    %c0_21 = arith.constant 0 : index
    %25 = vector.load %arg3[%c2, %c0_20, %c0_21] : memref<9x4x8xf32, #tpu.memory_space<vmem>>, vector<1x4x8xf32>
    %26 = vector.shape_cast %25 : vector<1x4x8xf32> to vector<4x8xf32>
    %cst_22 = arith.constant dense<0.000000e+00> : vector<144x8xf32>
    %27 = tpu.matmul %24, %26, %cst_22 {dimension_numbers = #tpu.dot_dimension_numbers<[1], [0], [0], [1], [0, 0, 1, 1], [], []>} : vector<144x4xf32>, vector<4x8xf32>, vector<144x8xf32> -> vector<144x8xf32>
    %28 = arith.addf %19, %27 : vector<144x8xf32>
    %c0_i32_23 = arith.constant 0 : i32
    %29 = arith.addi %0, %c0_i32_23 : i32
    %c0_24 = arith.constant 0 : index
    %c2_25 = arith.constant 2 : index
    %30 = arith.index_cast %29 : i32 to index
    %c0_26 = arith.constant 0 : index
    %c0_27 = arith.constant 0 : index
    %31 = vector.load %arg2[%c0_24, %c2_25, %30, %c0_26, %c0_27] : memref<1x4x10x17x4xf32, #tpu.memory_space<vmem>>, vector<1x1x9x16x4xf32>
    %32 = vector.shape_cast %31 : vector<1x1x9x16x4xf32> to vector<9x16x4xf32>
    %33 = vector.shape_cast %32 : vector<9x16x4xf32> to vector<144x4xf32>
    %c3 = arith.constant 3 : index
    %c0_28 = arith.constant 0 : index
    %c0_29 = arith.constant 0 : index
    %34 = vector.load %arg3[%c3, %c0_28, %c0_29] : memref<9x4x8xf32, #tpu.memory_space<vmem>>, vector<1x4x8xf32>
    %35 = vector.shape_cast %34 : vector<1x4x8xf32> to vector<4x8xf32>
    %cst_30 = arith.constant dense<0.000000e+00> : vector<144x8xf32>
    %36 = tpu.matmul %33, %35, %cst_30 {dimension_numbers = #tpu.dot_dimension_numbers<[1], [0], [0], [1], [0, 0, 1, 1], [], []>} : vector<144x4xf32>, vector<4x8xf32>, vector<144x8xf32> -> vector<144x8xf32>
    %37 = arith.addf %28, %36 : vector<144x8xf32>
    %c0_i32_31 = arith.constant 0 : i32
    %38 = arith.addi %0, %c0_i32_31 : i32
    %c0_32 = arith.constant 0 : index
    %c3_33 = arith.constant 3 : index
    %39 = arith.index_cast %38 : i32 to index
    %c0_34 = arith.constant 0 : index
    %c0_35 = arith.constant 0 : index
    %40 = vector.load %arg2[%c0_32, %c3_33, %39, %c0_34, %c0_35] : memref<1x4x10x17x4xf32, #tpu.memory_space<vmem>>, vector<1x1x9x16x4xf32>
    %41 = vector.shape_cast %40 : vector<1x1x9x16x4xf32> to vector<9x16x4xf32>
    %42 = vector.shape_cast %41 : vector<9x16x4xf32> to vector<144x4xf32>
    %c4 = arith.constant 4 : index
    %c0_36 = arith.constant 0 : index
    %c0_37 = arith.constant 0 : index
    %43 = vector.load %arg3[%c4, %c0_36, %c0_37] : memref<9x4x8xf32, #tpu.memory_space<vmem>>, vector<1x4x8xf32>
    %44 = vector.shape_cast %43 : vector<1x4x8xf32> to vector<4x8xf32>
    %cst_38 = arith.constant dense<0.000000e+00> : vector<144x8xf32>
    %45 = tpu.matmul %42, %44, %cst_38 {dimension_numbers = #tpu.dot_dimension_numbers<[1], [0], [0], [1], [0, 0, 1, 1], [], []>} : vector<144x4xf32>, vector<4x8xf32>, vector<144x8xf32> -> vector<144x8xf32>
    %46 = arith.addf %37, %45 : vector<144x8xf32>
    %c0_i32_39 = arith.constant 0 : i32
    %47 = arith.addi %0, %c0_i32_39 : i32
    %c0_40 = arith.constant 0 : index
    %c2_41 = arith.constant 2 : index
    %48 = arith.index_cast %47 : i32 to index
    %c1_42 = arith.constant 1 : index
    %c0_43 = arith.constant 0 : index
    %49 = vector.load %arg2[%c0_40, %c2_41, %48, %c1_42, %c0_43] : memref<1x4x10x17x4xf32, #tpu.memory_space<vmem>>, vector<1x1x9x16x4xf32>
    %50 = vector.shape_cast %49 : vector<1x1x9x16x4xf32> to vector<9x16x4xf32>
    %51 = vector.shape_cast %50 : vector<9x16x4xf32> to vector<144x4xf32>
    %c5 = arith.constant 5 : index
    %c0_44 = arith.constant 0 : index
    %c0_45 = arith.constant 0 : index
    %52 = vector.load %arg3[%c5, %c0_44, %c0_45] : memref<9x4x8xf32, #tpu.memory_space<vmem>>, vector<1x4x8xf32>
    %53 = vector.shape_cast %52 : vector<1x4x8xf32> to vector<4x8xf32>
    %cst_46 = arith.constant dense<0.000000e+00> : vector<144x8xf32>
    %54 = tpu.matmul %51, %53, %cst_46 {dimension_numbers = #tpu.dot_dimension_numbers<[1], [0], [0], [1], [0, 0, 1, 1], [], []>} : vector<144x4xf32>, vector<4x8xf32>, vector<144x8xf32> -> vector<144x8xf32>
    %55 = arith.addf %46, %54 : vector<144x8xf32>
    %c1_i32 = arith.constant 1 : i32
    %56 = arith.addi %0, %c1_i32 : i32
    %c0_47 = arith.constant 0 : index
    %c0_48 = arith.constant 0 : index
    %57 = arith.index_cast %56 : i32 to index
    %c0_49 = arith.constant 0 : index
    %c0_50 = arith.constant 0 : index
    %58 = vector.load %arg2[%c0_47, %c0_48, %57, %c0_49, %c0_50] : memref<1x4x10x17x4xf32, #tpu.memory_space<vmem>>, vector<1x1x9x16x4xf32>
    %59 = vector.shape_cast %58 : vector<1x1x9x16x4xf32> to vector<9x16x4xf32>
    %60 = vector.shape_cast %59 : vector<9x16x4xf32> to vector<144x4xf32>
    %c6 = arith.constant 6 : index
    %c0_51 = arith.constant 0 : index
    %c0_52 = arith.constant 0 : index
    %61 = vector.load %arg3[%c6, %c0_51, %c0_52] : memref<9x4x8xf32, #tpu.memory_space<vmem>>, vector<1x4x8xf32>
    %62 = vector.shape_cast %61 : vector<1x4x8xf32> to vector<4x8xf32>
    %cst_53 = arith.constant dense<0.000000e+00> : vector<144x8xf32>
    %63 = tpu.matmul %60, %62, %cst_53 {dimension_numbers = #tpu.dot_dimension_numbers<[1], [0], [0], [1], [0, 0, 1, 1], [], []>} : vector<144x4xf32>, vector<4x8xf32>, vector<144x8xf32> -> vector<144x8xf32>
    %64 = arith.addf %55, %63 : vector<144x8xf32>
    %c1_i32_54 = arith.constant 1 : i32
    %65 = arith.addi %0, %c1_i32_54 : i32
    %c0_55 = arith.constant 0 : index
    %c1_56 = arith.constant 1 : index
    %66 = arith.index_cast %65 : i32 to index
    %c0_57 = arith.constant 0 : index
    %c0_58 = arith.constant 0 : index
    %67 = vector.load %arg2[%c0_55, %c1_56, %66, %c0_57, %c0_58] : memref<1x4x10x17x4xf32, #tpu.memory_space<vmem>>, vector<1x1x9x16x4xf32>
    %68 = vector.shape_cast %67 : vector<1x1x9x16x4xf32> to vector<9x16x4xf32>
    %69 = vector.shape_cast %68 : vector<9x16x4xf32> to vector<144x4xf32>
    %c7 = arith.constant 7 : index
    %c0_59 = arith.constant 0 : index
    %c0_60 = arith.constant 0 : index
    %70 = vector.load %arg3[%c7, %c0_59, %c0_60] : memref<9x4x8xf32, #tpu.memory_space<vmem>>, vector<1x4x8xf32>
    %71 = vector.shape_cast %70 : vector<1x4x8xf32> to vector<4x8xf32>
    %cst_61 = arith.constant dense<0.000000e+00> : vector<144x8xf32>
    %72 = tpu.matmul %69, %71, %cst_61 {dimension_numbers = #tpu.dot_dimension_numbers<[1], [0], [0], [1], [0, 0, 1, 1], [], []>} : vector<144x4xf32>, vector<4x8xf32>, vector<144x8xf32> -> vector<144x8xf32>
    %73 = arith.addf %64, %72 : vector<144x8xf32>
    %c1_i32_62 = arith.constant 1 : i32
    %74 = arith.addi %0, %c1_i32_62 : i32
    %c0_63 = arith.constant 0 : index
    %c0_64 = arith.constant 0 : index
    %75 = arith.index_cast %74 : i32 to index
    %c1_65 = arith.constant 1 : index
    %c0_66 = arith.constant 0 : index
    %76 = vector.load %arg2[%c0_63, %c0_64, %75, %c1_65, %c0_66] : memref<1x4x10x17x4xf32, #tpu.memory_space<vmem>>, vector<1x1x9x16x4xf32>
    %77 = vector.shape_cast %76 : vector<1x1x9x16x4xf32> to vector<9x16x4xf32>
    %78 = vector.shape_cast %77 : vector<9x16x4xf32> to vector<144x4xf32>
    %c8 = arith.constant 8 : index
    %c0_67 = arith.constant 0 : index
    %c0_68 = arith.constant 0 : index
    %79 = vector.load %arg3[%c8, %c0_67, %c0_68] : memref<9x4x8xf32, #tpu.memory_space<vmem>>, vector<1x4x8xf32>
    %80 = vector.shape_cast %79 : vector<1x4x8xf32> to vector<4x8xf32>
    %cst_69 = arith.constant dense<0.000000e+00> : vector<144x8xf32>
    %81 = tpu.matmul %78, %80, %cst_69 {dimension_numbers = #tpu.dot_dimension_numbers<[1], [0], [0], [1], [0, 0, 1, 1], [], []>} : vector<144x4xf32>, vector<4x8xf32>, vector<144x8xf32> -> vector<144x8xf32>
    %82 = arith.addf %73, %81 : vector<144x8xf32>
    %c0_70 = arith.constant 0 : index
    %c0_71 = arith.constant 0 : index
    %83 = vector.load %arg4[%c0_70, %c0_71] : memref<1x8xf32, #tpu.memory_space<vmem>>, vector<1x8xf32>
    %84 = vector.broadcast %83 : vector<1x8xf32> to vector<144x8xf32>
    %85 = arith.addf %82, %84 : vector<144x8xf32>
    %86 = vector.shape_cast %85 : vector<144x8xf32> to vector<9x16x8xf32>
    %87 = vector.extract_strided_slice %86 {offsets = [0, 0, 0], sizes = [9, 8, 8], strides = [1, 1, 1]} : vector<9x16x8xf32> to vector<9x8x8xf32>
    %88 = vector.extract_strided_slice %86 {offsets = [0, 1, 0], sizes = [9, 8, 8], strides = [1, 1, 1]} : vector<9x16x8xf32> to vector<9x8x8xf32>
    %89 = arith.maximumf %87, %88 : vector<9x8x8xf32>
    %90 = vector.extract_strided_slice %89 {offsets = [0, 0, 0], sizes = [8, 8, 8], strides = [1, 1, 1]} : vector<9x8x8xf32> to vector<8x8x8xf32>
    %91 = vector.extract_strided_slice %89 {offsets = [1, 0, 0], sizes = [8, 8, 8], strides = [1, 1, 1]} : vector<9x8x8xf32> to vector<8x8x8xf32>
    %92 = arith.maximumf %90, %91 : vector<8x8x8xf32>
    %93 = vector.shape_cast %92 : vector<8x8x8xf32> to vector<64x8xf32>
    %94 = tpu.transpose %93, [1, 0] : vector<64x8xf32> -> vector<8x64xf32>
    %c0_72 = arith.constant 0 : index
    %c0_73 = arith.constant 0 : index
    %c0_74 = arith.constant 0 : index
    %95 = vector.load %arg5[%c0_72, %c0_73, %c0_74] : memref<1x8x64xf32, #tpu.memory_space<vmem>>, vector<1x8x64xf32>
    %96 = vector.shape_cast %95 : vector<1x8x64xf32> to vector<8x64xf32>
    %97 = vector.shape_cast %94 : vector<8x64xf32> to vector<1x8x64xf32>
    tpu.vector_store %arg5[%c0_72, %c0_73, %c0_74], %97 {strides = array<i32>} : memref<1x8x64xf32, #tpu.memory_space<vmem>>, vector<1x8x64xf32>,
    return
  }
  func.func @transform_0(%arg0: i32, %arg1: i32) -> (i32, i32, i32, i32, i32) {
    %c0_i32 = arith.constant 0 : i32
    %c0_i32_0 = arith.constant 0 : i32
    %c0_i32_1 = arith.constant 0 : i32
    %c0_i32_2 = arith.constant 0 : i32
    %c0_i32_3 = arith.constant 0 : i32
    return %arg0, %c0_i32, %c0_i32_0, %c0_i32_1, %c0_i32_2 : i32, i32, i32, i32, i32
  }
  func.func @transform_1(%arg0: i32, %arg1: i32) -> (i32, i32, i32) {
    %c0_i32 = arith.constant 0 : i32
    %c0_i32_0 = arith.constant 0 : i32
    %c0_i32_1 = arith.constant 0 : i32
    %c0_i32_2 = arith.constant 0 : i32
    return %c0_i32, %c0_i32_0, %c0_i32_1 : i32, i32, i32
  }
  func.func @transform_2(%arg0: i32, %arg1: i32) -> (i32, i32) {
    %c0_i32 = arith.constant 0 : i32
    %c0_i32_0 = arith.constant 0 : i32
    %c0_i32_1 = arith.constant 0 : i32
    return %c0_i32, %c0_i32_0 : i32, i32
  }
  func.func @transform_3(%arg0: i32, %arg1: i32) -> (i32, i32, i32) {
    %c0_i32 = arith.constant 0 : i32
    %c0_i32_0 = arith.constant 0 : i32
    return %arg0, %c0_i32, %arg1 : i32, i32, i32
  }
}

</mosaic_0001>

<bundles_post_ra>
// kernel: tpu_custom_call.1
= control target key start
LH: loop header
LB: loop body
LE: loop exit
PB: predicated region body
PF: predicated region fallthrough
CT: control target
= control target key end

     0   :  { %8 = vsyncpa [#allocation3], 0  ;;  %s3111_s0 = inlined_call_operand.vmem [shape: f32[2,4,10,17,4], index: 0, kind: input, shape index: {}]   ;;  %s3112_s1 = inlined_call_operand.vmem [shape: f32[9,4,8], index: 1, kind: input, shape index: {}]   ;;  %s3113_s2 = inlined_call_operand.vmem [shape: f32[1,8], index: 2, kind: input, shape index: {}]   ;;  %s3114_s3 = inlined_call_operand.hbm [shape: f32[2,8,64], index: 3, kind: output, shape index: {}]  }
   0x1   :  { %10 = vsyncpa [#allocation3 + $0x1], 0  ;;  %s2365_s12 = smov 0   ;;  %s2367_s13 = smov 0  }
   0x2   :  { %s2369_s14 = smov 0   ;;  %s2371_s15 = smov 0  }
   0x3   :  { %s2373_s16 = smov 0   ;;  %s2375_s17 = smov 0  }
   0x4 LB: > { %s1888_s18 = sadd.s32 4294967295, %s2343_s17   ;;  %s1889_s19 = sadd.s32 4294967294, %s2343_s17   ;;  %s2343_s17 = sphi %s2375_s17, %s16_s17   ;;  %s2339_s16 = sphi %s2373_s16, %s3164_s16   ;;  %s2335_s15 = sphi %s2371_s15, %s3163_s15   ;;  %s2331_s14 = sphi %s2369_s14, %s3162_s14   ;;  %s2327_s13 = sphi %s2367_s13, %s3161_s13   ;;  %s2323_s12 = sphi %s2365_s12, %s3160_s12  }
   0x5   : > { %s28_s20 = sadd.s32 1, %s2339_s16  ;;  %s105_s21 = sadd.s32 1, %s2331_s14 }
   0x6   : > { %p30_p0 = scmp.ge.s32.totalorder %s28_s20, 2  ;;  %p115_p1 = scmp.ne.s32.totalorder %s2331_s14, %s2327_s13 }
   0x7   : > { %p116_p2 = scmp.eq.s32.totalorder %s1888_s18, 1  ;;  %p121_p3 = scmp.ne.s32.totalorder %s2327_s13, %s2323_s12 }
   0x8   : > { %s3166_s20 = smov (%p30_p0, %s28_s20), 0  ;;  %p122_p5 = scmp.eq.s32.totalorder %s1889_s19, 1 }
   0x9   : > { %p2405_p4 = por %p116_p2, %p115_p1  ;;  %s100_s23 = ssub.s32 %s2339_s16, %s3166_s20 }
   0xa   : > { %p1892_p6 = scmp.ge.s32.totalorder %s2343_s17, 1  ;;  %p103_p7 = scmp.eq.s32.totalorder %s100_s23, 0 }
   0xb   : > { %p2412_p8 = por %p122_p5, %p121_p3  ;;  %p154_p9 = scmp.lt.s32.totalorder %s2343_s17, 3 }
   0xc   : > { %s2418_s25 = scalar_select %p103_p7, %s2331_s14, %s105_s21  }
   0xd   : > { %p155_p10 = pnand %p1892_p6, %p154_p9 }
   0xf   : > { %158 = sbr.rel (%p155_p10) target bundleno = 608 (0x260), region = 32 }
  0x14   : > { %v1913_v0 = vld [vmem:[%s3112_s1 + $0x4] sm:$0xf]  ;;  %vm282_vm0 = vcmask 1043456   ;;  %p178_p11 = scmp.lt.s32.totalorder %s2335_s15, 1  ;;  %v1952_v1 = vld [vmem:[%s3112_s1 + $0x8] sm:$0xf] }
  0x15   : > { %2204 = vmatpush.msk.msra.mxu1 %vm282_vm0, %v1913_v0  ;;  %2205 = vmatpush.msk.msra.mxu2 %vm282_vm0, %v1913_v0  ;;  %v204_v2 = vld [vmem:[%s3112_s1] sm:$0xf]  ;;  %v2028_v3 = vld [vmem:[%s3112_s1 + $0x10] sm:$0xf]  ;;  %v1990_v4 = vld [vmem:[%s3112_s1 + $0xc] sm:$0xf] }
  0x16   : > { %s179_s7 = scalar_select %p178_p11, %s2335_s15, 1  ;;  %1914 = vmatpush.msk.msra.mxu0 %vm282_vm0, %v1913_v0  ;;  %2206 = vmatpush.msk.msra.mxu3 %vm282_vm0, %v1913_v0  ;;  %vm227_vm1 = vcmask 31744   ;;  %v2104_v13 = vld [vmem:[%s3112_s1 + $0x18] sm:$0xf]  ;;  %v2142_v14 = vld [vmem:[%s3112_s1 + $0x1c] sm:$0xf] }
  0x17   : > { %1953 = vmatpush.msk.msrb.mxu2 %vm282_vm0, %v1952_v1  ;;  %1933 = vmatpush.msk.msrb.mxu1 %vm282_vm0, %v204_v2  ;;  %v2066_v15 = vld [vmem:[%s3112_s1 + $0x14] sm:$0xf]  ;;  %v2180_v20 = vld [vmem:[%s3112_s1 + $0x20] sm:$0xf]  ;;  %vm1696_vm2 = vcmask 1046528   ;;  %s2201_s9 = sshll.u32 %s2335_s15, 3 }
  0x18   : > { %s2207_s10 = smul.u32 960, %s179_s7  ;;  %2029 = vmatpush.msk.msrb.mxu0 %vm282_vm0, %v2028_v3  ;;  %1991 = vmatpush.msk.msrb.mxu3 %vm282_vm0, %v1990_v4  ;;  %s175_s7 = sand.u32 1, %s2327_s13   ;;  %vm1782_vm3 = vcmask 523264  }
  0x19   : > { %s1893_s8 = sshll.u32 %s175_s7, 3  ;;  %s1796_s18 = scalar_lea.hbm %s3114_s3, %s2201_s9 }
  0x1a   : > { %s2448_s19 = scalar_lea.vmem %s3111_s0, %s2207_s10  ;;  %s1800_s23 = sshll.u32 %s1796_s18, 4  ;;  %s1801_s23 = int_to_ptr.hbm [resolvable:$true] %s1800_s23 }
  0x1b   : > { %v2451_v5 = vld [vmem:[%s2448_s19 + $0x128] sm:$0xff]  ;;  %v1895_v7 = vld [vmem:[%s2448_s19 + $0xf0] sm:$0xff]  ;;  %v2463_v8 = vld [vmem:[%s2448_s19 + $0x1a0] sm:$0xff]  ;;  %s1785_s26 = scalar_lea.sflag [#allocation3], %s175_s7  ;;  %s2279_s27 = sshra.s32 %s1801_s23, 4  ;;  %s2280_s27 = int_to_ptr.hbm [resolvable:$true] %s2279_s27 }
  0x1c   : > { %v2454_v6 = vld [vmem:[%s2448_s19 + $0x168] sm:$0xff]  ;;  %1920 = vmatmul.msk.f32.vlgmr.msra.gmra.mxu1 %vm227_vm1, %v2451_v5  ;;  %1915 = vmatmul.msk.f32.vlgmr.msra.gmra.mxu0 %vm227_vm1, %v1895_v7  ;;  %3128 = vst [vmem:[#allocation5_spill] sm:$0xff] %v2463_v8  ;;  %v2468_v9 = vld [vmem:[%s2448_s19 + $0x138] sm:$0xff]  ;;  %v2471_v10 = vld [vmem:[%s2448_s19 + $0x170] sm:$0xff]  ;;  %s2281_s28 = scalar_lea.hbm %s2280_s27, 8  ;;  %s2285_s30 = scalar_lea.hbm %s3114_s3, 16 }
  0x1d   : > { %1925 = vmatmul.msk.f32.vlgmr.msra.gmra.mxu2 %vm227_vm1, %v2454_v6  ;;  %1930 = vmatmul.msk.f32.vlgmr.msra.gmra.mxu3 %vm227_vm1, %v2463_v8  ;;  %v1896_v11 = vld [vmem:[%s2448_s19 + $0xf8] sm:$0xff]  ;;  %v2475_v12 = vld [vmem:[%s2448_s19 + $0x1b0] sm:$0xff]  ;;  %v2497_v16 = vld [vmem:[%s2448_s19 + $0x140] sm:$0xff]  ;;  %p2282_p12 = scmp.ne.s32.totalorder %s2280_s27, %s2281_s28  ;;  %p2286_p1 = scmp.lt.s32.totalorder %s2280_s27, %s3114_s3 }
  0x1e   : > { %3129 = vst [vmem:[#allocation6_spill] sm:$0xff] %v2475_v12  ;;  %2105 = vmatpush.msk.msra.mxu2 %vm282_vm0, %v2104_v13  ;;  %2067 = vmatpush.msk.msra.mxu1 %vm282_vm0, %v2066_v15  ;;  %v2500_v17 = vld [vmem:[%s2448_s19 + $0x180] sm:$0xff]  ;;  %v2503_v18 = vld [vmem:[%s2448_s19 + $0x108] sm:$0xff]  ;;  %v2506_v19 = vld [vmem:[%s2448_s19 + $0x1b8] sm:$0xff]  ;;  %p2287_p2 = scmp.lt.s32.totalorder %s2285_s30, %s2281_s28 }
  0x1f   : > { %2143 = vmatpush.msk.msra.mxu3 %vm282_vm0, %v2142_v14  ;;  %3130 = vst [vmem:[#allocation7_spill] sm:$0xff] %v2506_v19  ;;  %2181 = vmatpush.msk.msra.mxu0 %vm282_vm0, %v2180_v20  ;;  %v2521_v21 = vld [vmem:[%s2448_s19 + $0x150] sm:$0xff]  ;;  %v2524_v22 = vld [vmem:[%s2448_s19 + $0x188] sm:$0xff]  ;;  %v1972_v24 = vld [vmem:[%s2448_s19 + $0x1e0] sm:$0xff]  ;;  %p2283_p13 = pnand %p2282_p12, %p2405_p4 }
  0x20   : > { %v2527_v23 = vld [vmem:[%s2448_s19 + $0x110] sm:$0xff]  ;;  %v2538_v25 = vld [vmem:[%s2448_s19 + $0x158] sm:$0xff]  ;;  %v2544_v27 = vld [vmem:[%s2448_s19 + $0x120] sm:$0xff]  ;;  %p2288_p3 = por %p2287_p2, %p2286_p1 }
  0x21   : > { %v2541_v26 = vld [vmem:[%s2448_s19 + $0x198] sm:$0xff]  ;;  %v1973_v28 = vld [vmem:[%s2448_s19 + $0x1e8] sm:$0xff]  ;;  %v186_v29 = vld [vmem:[%s2448_s19] sm:$0xff]  ;;  %p2284_p0 = pneg %p2283_p13 }
  0x22   : > { %v485_v30 = vld [vmem:[%s2448_s19 + $0x1] sm:$0xff]  ;;  %v2010_v31 = vld [vmem:[%s2448_s19 + $0x2d0] sm:$0xff]  ;;  %v1974_v32 = vld [vmem:[%s2448_s19 + $0x1f8] sm:$0xff] }
  0x23   : > { %v187_v33 = vld [vmem:[%s2448_s19 + $0x8] sm:$0xff]  ;;  %v2011_v35 = vld [vmem:[%s2448_s19 + $0x2d8] sm:$0xff]  ;;  %v1975_v36 = vld [vmem:[%s2448_s19 + $0x200] sm:$0xff]  ;;  %p2289_p5 = pnand %p2288_p3, %p2284_p0 }
  0x24   : > { %1921 = vmatmul.msk.f32.gmra.mxu1 %vm227_vm1, %v2468_v9  ;;  %1916 = vmatmul.msk.f32.gmra.mxu0 %vm227_vm1, %v1896_v11  ;;  %v486_v34 = vld [vmem:[%s2448_s19 + $0x9] sm:$0xff]  ;;  %v2571_v37 = vld [vmem:[%s2448_s19 + $0x18] sm:$0xff]  ;;  %v2585_v41 = vld [vmem:[%s2448_s19 + $0x20] sm:$0xff] }
  0x25   : > { %1926 = vmatmul.msk.f32.gmra.mxu2 %vm227_vm1, %v2471_v10  ;;  %1931 = vmatmul.msk.f32.gmra.mxu3 %vm227_vm1, %v2475_v12  ;;  %v2574_v38 = vld [vmem:[%s2448_s19 + $0x19] sm:$0xff]  ;;  %v2012_v39 = vld [vmem:[%s2448_s19 + $0x2e8] sm:$0xff]  ;;  %v1976_v40 = vld [vmem:[%s2448_s19 + $0x210] sm:$0xff] }
  0x26   : > { %v2588_v42 = vld [vmem:[%s2448_s19 + $0x21] sm:$0xff]  ;;  %v2013_v43 = vld [vmem:[%s2448_s19 + $0x2f0] sm:$0xff]  ;;  %v1977_v44 = vld [vmem:[%s2448_s19 + $0x218] sm:$0xff] }
  0x27   : > { %v2599_v45 = vld [vmem:[%s2448_s19 + $0x30] sm:$0xff]  ;;  %v2014_v47 = vld [vmem:[%s2448_s19 + $0x300] sm:$0xff]  ;;  %v1978_v48 = vld [vmem:[%s2448_s19 + $0x228] sm:$0xff] }
  0x28   : > { %v2602_v46 = vld [vmem:[%s2448_s19 + $0x31] sm:$0xff]  ;;  %v2616_v50 = vld [vmem:[%s2448_s19 + $0x39] sm:$0xff]  ;;  %v2015_v51 = vld [vmem:[%s2448_s19 + $0x308] sm:$0xff] }
  0x29   : > { %v2613_v49 = vld [vmem:[%s2448_s19 + $0x38] sm:$0xff]  ;;  %v1979_v52 = vld [vmem:[%s2448_s19 + $0x230] sm:$0xff]  ;;  %v2627_v53 = vld [vmem:[%s2448_s19 + $0x48] sm:$0xff] }
  0x2a   : > { %v2630_v54 = vld [vmem:[%s2448_s19 + $0x49] sm:$0xff]  ;;  %v2016_v55 = vld [vmem:[%s2448_s19 + $0x318] sm:$0xff]  ;;  %v1980_v56 = vld [vmem:[%s2448_s19 + $0x240] sm:$0xff] }
  0x2b   : > { %v2641_v57 = vld [vmem:[%s2448_s19 + $0x50] sm:$0xff]  ;;  %v2017_v59 = vld [vmem:[%s2448_s19 + $0x320] sm:$0xff]  ;;  %v1981_v60 = vld [vmem:[%s2448_s19 + $0x248] sm:$0xff] }
  0x2c   : > { %1922 = vmatmul.msk.f32.gmra.mxu1 %vm227_vm1, %v2497_v16  ;;  %1917 = vmatmul.msk.f32.gmra.mxu0 %vm227_vm1, %v2503_v18  ;;  %v2644_v58 = vld [vmem:[%s2448_s19 + $0x51] sm:$0xff]  ;;  %v2655_v61 = vld [vmem:[%s2448_s19 + $0x60] sm:$0xff]  ;;  %v2669_v1 = vld [vmem:[%s2448_s19 + $0x68] sm:$0xff] }
  0x2d   : > { %1927 = vmatmul.msk.f32.gmra.mxu2 %vm227_vm1, %v2500_v17  ;;  %1932 = vmatmul.msk.f32.gmra.mxu3 %vm227_vm1, %v2506_v19  ;;  %v2658_v62 = vld [vmem:[%s2448_s19 + $0x61] sm:$0xff]  ;;  %v2018_v63 = vld [vmem:[%s2448_s19 + $0x330] sm:$0xff]  ;;  %v1982_v0 = vld [vmem:[%s2448_s19 + $0x258] sm:$0xff] }
  0x2e   : > { %v2672_v2 = vld [vmem:[%s2448_s19 + $0x69] sm:$0xff]  ;;  %v2019_v3 = vld [vmem:[%s2448_s19 + $0x338] sm:$0xff]  ;;  %v1983_v4 = vld [vmem:[%s2448_s19 + $0x260] sm:$0xff] }
  0x2f   : > { %v2683_v7 = vld [vmem:[%s2448_s19 + $0x78] sm:$0xff]  ;;  %v2020_v13 = vld [vmem:[%s2448_s19 + $0x348] sm:$0xff]  ;;  %v1984_v14 = vld [vmem:[%s2448_s19 + $0x270] sm:$0xff] }
  0x30   : > { %v2686_v11 = vld [vmem:[%s2448_s19 + $0x79] sm:$0xff]  ;;  %v2821_v8 = vld [vmem:[%s2448_s19 + $0xc9] sm:$0xff] }
  0x31   : > { %v2699_v20 = vld [vmem:[%s2448_s19 + $0x80] sm:$0xff] }
  0x32   : > { %v2803_v19 = vld [vmem:[%s2448_s19 + $0xc0] sm:$0xff] }
  0x33   : > { %3142 = vst [vmem:[#allocation19_spill] sm:$0xff] %v2803_v19 }
  0x34   : > { %1923 = vmatmul.msk.f32.gmra.mxu1 %vm227_vm1, %v2521_v21  ;;  %1918 = vmatmul.msk.f32.gmra.mxu0 %vm227_vm1, %v2527_v23 }
  0x35   : > { %1928 = vmatmul.msk.f32.gmra.mxu2 %vm227_vm1, %v2524_v22  ;;  %1992 = vmatmul.msk.f32.vlgmr.msrb.gmra.mxu3 %vm227_vm1, %v1972_v24  ;;  %v2702_v24 = vld [vmem:[%s2448_s19 + $0x81] sm:$0xff] }
  0x3c   : > { %1924 = vmatmul.msk.f32.gmra.mxu1 %vm227_vm1, %v2538_v25  ;;  %1919 = vmatmul.msk.f32.gmra.mxu0 %vm227_vm1, %v2544_v27 }
  0x3d   : > { %1929 = vmatmul.msk.f32.gmra.mxu2 %vm227_vm1, %v2541_v26  ;;  %1993 = vmatmul.msk.f32.gmra.mxu3 %vm227_vm1, %v1973_v28 }
  0x44   : > { %1934 = vmatmul.msk.f32.vlgmr.msrb.gmra.mxu1 %vm227_vm1, %v186_v29  ;;  %2030 = vmatmul.msk.f32.vlgmr.msrb.gmra.mxu0 %vm227_vm1, %v2010_v31  ;;  %v2021_v29 = vld [vmem:[%s2448_s19 + $0x350] sm:$0xff] }
  0x45   : > { %1954 = vmatmul.msk.f32.vlgmr.msrb.gmra.mxu2 %vm227_vm1, %v485_v30  ;;  %1994 = vmatmul.msk.f32.gmra.mxu3 %vm227_vm1, %v1974_v32  ;;  %v1985_v30 = vld [vmem:[%s2448_s19 + $0x278] sm:$0xff] }
  0x4c   : > { %1935 = vmatmul.msk.f32.gmra.mxu1 %vm227_vm1, %v187_v33  ;;  %2031 = vmatmul.msk.f32.gmra.mxu0 %vm227_vm1, %v2011_v35  ;;  %v2719_v33 = vld [vmem:[%s2448_s19 + $0x90] sm:$0xff] }
  0x4d   : > { %1955 = vmatmul.msk.f32.gmra.mxu2 %vm227_vm1, %v486_v34  ;;  %1995 = vmatmul.msk.f32.gmra.mxu3 %vm227_vm1, %v1975_v36  ;;  %v2722_v34 = vld [vmem:[%s2448_s19 + $0x91] sm:$0xff] }
  0x54   : > { %1936 = vmatmul.msk.f32.gmra.mxu1 %vm227_vm1, %v2571_v37  ;;  %2032 = vmatmul.msk.f32.gmra.mxu0 %vm227_vm1, %v2012_v39  ;;  %v2022_v39 = vld [vmem:[%s2448_s19 + $0x360] sm:$0xff] }
  0x55   : > { %1956 = vmatmul.msk.f32.gmra.mxu2 %vm227_vm1, %v2574_v38  ;;  %1996 = vmatmul.msk.f32.gmra.mxu3 %vm227_vm1, %v1976_v40  ;;  %v1986_v40 = vld [vmem:[%s2448_s19 + $0x288] sm:$0xff] }
  0x5c   : > { %1937 = vmatmul.msk.f32.gmra.mxu1 %vm227_vm1, %v2585_v41  ;;  %2033 = vmatmul.msk.f32.gmra.mxu0 %vm227_vm1, %v2013_v43 }
  0x5d   : > { %1957 = vmatmul.msk.f32.gmra.mxu2 %vm227_vm1, %v2588_v42  ;;  %1997 = vmatmul.msk.f32.gmra.mxu3 %vm227_vm1, %v1977_v44 }
  0x64   : > { %1938 = vmatmul.msk.f32.gmra.mxu1 %vm227_vm1, %v2599_v45  ;;  %2034 = vmatmul.msk.f32.gmra.mxu0 %vm227_vm1, %v2014_v47  ;;  %v2741_v47 = vld [vmem:[%s2448_s19 + $0x98] sm:$0xff] }
  0x65   : > { %1958 = vmatmul.msk.f32.gmra.mxu2 %vm227_vm1, %v2602_v46  ;;  %1998 = vmatmul.msk.f32.gmra.mxu3 %vm227_vm1, %v1978_v48  ;;  %3132 = vst [vmem:[#allocation9_spill] sm:$0xff] %v2741_v47  ;;  %v2744_v48 = vld [vmem:[%s2448_s19 + $0x99] sm:$0xff] }
  0x66   : > { %3133 = vst [vmem:[#allocation10_spill] sm:$0xff] %v2744_v48 }
  0x6c   : > { %1939 = vmatmul.msk.f32.gmra.mxu1 %vm227_vm1, %v2613_v49  ;;  %2035 = vmatmul.msk.f32.gmra.mxu0 %vm227_vm1, %v2015_v51 }
  0x6d   : > { %1959 = vmatmul.msk.f32.gmra.mxu2 %vm227_vm1, %v2616_v50  ;;  %1999 = vmatmul.msk.f32.gmra.mxu3 %vm227_vm1, %v1979_v52 }
  0x74   : > { %1940 = vmatmul.msk.f32.gmra.mxu1 %vm227_vm1, %v2627_v53  ;;  %2036 = vmatmul.msk.f32.gmra.mxu0 %vm227_vm1, %v2016_v55  ;;  %v2023_v55 = vld [vmem:[%s2448_s19 + $0x368] sm:$0xff] }
  0x75   : > { %1960 = vmatmul.msk.f32.gmra.mxu2 %vm227_vm1, %v2630_v54  ;;  %2000 = vmatmul.msk.f32.gmra.mxu3 %vm227_vm1, %v1980_v56  ;;  %v1987_v56 = vld [vmem:[%s2448_s19 + $0x290] sm:$0xff] }
  0x7c   : > { %1941 = vmatmul.msk.f32.gmra.mxu1 %vm227_vm1, %v2641_v57  ;;  %2037 = vmatmul.msk.f32.gmra.mxu0 %vm227_vm1, %v2017_v59 }
  0x7d   : > { %1961 = vmatmul.msk.f32.gmra.mxu2 %vm227_vm1, %v2644_v58  ;;  %2001 = vmatmul.msk.f32.gmra.mxu3 %vm227_vm1, %v1981_v60 }
  0x84   : > { %1942 = vmatmul.msk.f32.gmra.mxu1 %vm227_vm1, %v2655_v61  ;;  %2038 = vmatmul.msk.f32.gmra.mxu0 %vm227_vm1, %v2018_v63  ;;  %v2763_v63 = vld [vmem:[%s2448_s19 + $0xa8] sm:$0xff] }
  0x85   : > { %1962 = vmatmul.msk.f32.gmra.mxu2 %vm227_vm1, %v2658_v62  ;;  %2002 = vmatmul.msk.f32.gmra.mxu3 %vm227_vm1, %v1982_v0  ;;  %3135 = vst [vmem:[#allocation12_spill] sm:$0xff] %v2763_v63  ;;  %v2766_v0 = vld [vmem:[%s2448_s19 + $0xa9] sm:$0xff] }
  0x86   : > { %3136 = vst [vmem:[#allocation13_spill] sm:$0xff] %v2766_v0 }
  0x8c   : > { %1943 = vmatmul.msk.f32.gmra.mxu1 %vm227_vm1, %v2669_v1  ;;  %2039 = vmatmul.msk.f32.gmra.mxu0 %vm227_vm1, %v2019_v3 }
  0x8d   : > { %1963 = vmatmul.msk.f32.gmra.mxu2 %vm227_vm1, %v2672_v2  ;;  %2003 = vmatmul.msk.f32.gmra.mxu3 %vm227_vm1, %v1983_v4 }
  0x94   : > { %1944 = vmatmul.msk.f32.gmra.mxu1 %vm227_vm1, %v2683_v7  ;;  %2040 = vmatmul.msk.f32.gmra.mxu0 %vm227_vm1, %v2020_v13  ;;  %v2024_v13 = vld [vmem:[%s2448_s19 + $0x378] sm:$0xff] }
  0x95   : > { %1964 = vmatmul.msk.f32.gmra.mxu2 %vm227_vm1, %v2686_v11  ;;  %2004 = vmatmul.msk.f32.gmra.mxu3 %vm227_vm1, %v1984_v14  ;;  %v1988_v14 = vld [vmem:[%s2448_s19 + $0x2a0] sm:$0xff] }
  0x99   : > { %v2696_v15 = vpop.f32.mrf.mxu1  ;;  %v2704_v28 = vpop.f32.mrf.mxu0 }
  0x9c   : > { %1945 = vmatmul.msk.f32.gmra.mxu1 %vm227_vm1, %v2699_v20  ;;  %2041 = vmatmul.msk.f32.gmra.mxu0 %vm227_vm1, %v2021_v29 }
  0x9d   : > { %1965 = vmatmul.msk.f32.gmra.mxu2 %vm227_vm1, %v2702_v24  ;;  %2005 = vmatmul.msk.f32.gmra.mxu3 %vm227_vm1, %v1985_v30 }
  0xa0   : > { %v2714_v31 = vpop.f32.mrf.mxu2  ;;  %v2724_v35 = vpop.f32.mrf.mxu3 }
  0xa1   : > { %v2716_v32 = vpop.f32.mrf.mxu1  ;;  %3131 = vst [vmem:[#allocation8_spill] sm:$0xff] %v2724_v35  ;;  %v2726_v36 = vpop.f32.mrf.mxu0  ;;  %v2806_v35 = vld [vmem:[%s2448_s19 + $0xc1] sm:$0xff] }
  0xa2   : > { %3143 = vst [vmem:[#allocation20_spill] sm:$0xff] %v2806_v35 }
  0xa4   : > { %1946 = vmatmul.msk.f32.gmra.mxu1 %vm227_vm1, %v2719_v33  ;;  %2042 = vmatmul.msk.f32.gmra.mxu0 %vm227_vm1, %v2022_v39  ;;  %v2785_v39 = vld [vmem:[%s2448_s19 + $0xb0] sm:$0xff] }
  0xa5   : > { %1966 = vmatmul.msk.f32.gmra.mxu2 %vm227_vm1, %v2722_v34  ;;  %2006 = vmatmul.msk.f32.gmra.mxu3 %vm227_vm1, %v1986_v40  ;;  %3139 = vst [vmem:[#allocation16_spill] sm:$0xff] %v2785_v39  ;;  %v2788_v40 = vld [vmem:[%s2448_s19 + $0xb1] sm:$0xff] }
  0xa6   : > { %3140 = vst [vmem:[#allocation17_spill] sm:$0xff] %v2788_v40 }
  0xa8   : > { %v2736_v43 = vpop.f32.mrf.mxu2  ;;  %v2746_v51 = vpop.f32.mrf.mxu3 }
  0xa9   : > { %v2738_v44 = vpop.f32.mrf.mxu1  ;;  %3134 = vst [vmem:[#allocation11_spill] sm:$0xff] %v2746_v51  ;;  %v2748_v52 = vpop.f32.mrf.mxu0  ;;  %v1989_v51 = vld [vmem:[%s2448_s19 + $0x2a8] sm:$0xff] }
  0xac   : > { %1947 = vmatmul.msk.f32.gmra.mxu1 %vm227_vm1, %v2741_v47  ;;  %2043 = vmatmul.msk.f32.gmra.mxu0 %vm227_vm1, %v2023_v55  ;;  %v2027_v47 = vld [vmem:[%s2448_s19 + $0x398] sm:$0xff] }
  0xad   : > { %1967 = vmatmul.msk.f32.gmra.mxu2 %vm227_vm1, %v2744_v48  ;;  %2007 = vmatmul.msk.f32.gmra.mxu3 %vm227_vm1, %v1987_v56 }
  0xb0   : > { %v2758_v59 = vpop.f32.mrf.mxu2  ;;  %v2768_v3 = vpop.f32.mrf.mxu3 }
  0xb1   : > { %v2760_v60 = vpop.f32.mrf.mxu1  ;;  %3137 = vst [vmem:[#allocation14_spill] sm:$0xff] %v2768_v3  ;;  %v2770_v4 = vpop.f32.mrf.mxu0  ;;  %v2025_v3 = vld [vmem:[%s2448_s19 + $0x380] sm:$0xff] }
  0xb4   : > { %1948 = vmatmul.msk.f32.gmra.mxu1 %vm227_vm1, %v2763_v63  ;;  %2044 = vmatmul.msk.f32.gmra.mxu0 %vm227_vm1, %v2024_v13  ;;  %v2818_v63 = vld [vmem:[%s2448_s19 + $0xc8] sm:$0xff] }
  0xb5   : > { %1968 = vmatmul.msk.f32.gmra.mxu2 %vm227_vm1, %v2766_v0  ;;  %2008 = vmatmul.msk.f32.gmra.mxu3 %vm227_vm1, %v1988_v14 }
  0xb8   : > { %v2780_v29 = vpop.f32.mrf.mxu2  ;;  %v747_v55 = vpop.f32.mrf.mxu3 }
  0xb9   : > { %3138 = vst [vmem:[#allocation15_spill] sm:$0xff] %v2780_v29  ;;  %v2782_v30 = vpop.f32.mrf.mxu1  ;;  %v2790_v56 = vpop.f32.mrf.mxu0 }
  0xbc   : > { %1949 = vmatmul.msk.f32.gmra.mxu1 %vm227_vm1, %v2785_v39  ;;  %2045 = vmatmul.msk.f32.gmra.mxu0 %vm227_vm1, %v2025_v3  ;;  %v2026_v39 = vld [vmem:[%s2448_s19 + $0x390] sm:$0xff] }
  0xbd   : > { %1969 = vmatmul.msk.f32.gmra.mxu2 %vm227_vm1, %v2788_v40  ;;  %2009 = vmatmul.msk.f32.gmra.mxu3 %vm227_vm1, %v1989_v51 }
  0xc0   : > { %v2800_v13 = vpop.f32.mrf.mxu2  ;;  %v750_v12 = vpop.f32.mrf.mxu3 }
  0xc1   : > { %3141 = vst [vmem:[#allocation18_spill] sm:$0xff] %v2800_v13  ;;  %v431_v14 = vpop.f32.mrf.mxu1  ;;  %v915_v0 = vpop.f32.mrf.mxu0 }
  0xc2   : > { %v432_v51 = vadd.f32 %v431_v14, %v2704_v28 }
  0xc4   : > { %1950 = vmatmul.msk.f32.gmra.mxu1 %vm227_vm1, %v2803_v19  ;;  %2046 = vmatmul.msk.f32.gmra.mxu0 %vm227_vm1, %v2026_v39 }
  0xc5   : > { %1970 = vmatmul.msk.f32.gmra.mxu2 %vm227_vm1, %v2806_v35  ;;  %2144 = vmatmul.msk.f32.vlgmr.msra.gmra.mxu3 %vm227_vm1, %v2503_v18 }
  0xc8   : > { %v579_v3 = vpop.f32.mrf.mxu2  ;;  %v753_v29 = vpop.f32.mrf.mxu3 }
  0xc9   : > { %v633_v40 = vadd.f32 %v579_v3, %v432_v51  ;;  %v434_v13 = vpop.f32.mrf.mxu1  ;;  %v918_v48 = vpop.f32.mrf.mxu0 }
  0xca   : > { %v435_v18 = vadd.f32 %v434_v13, %v2726_v36  ;;  %v2049_v13 = vld [vmem:[%s2448_s19 + $0x1e9] sm:$0xff] }
  0xcb   : > { %v801_v19 = vadd.f32 %v747_v55, %v633_v40  ;;  %v2048_v55 = vld [vmem:[%s2448_s19 + $0x1e1] sm:$0xff] }
  0xcc   : > { %1951 = vmatmul.msk.f32.gmra.mxu1 %vm227_vm1, %v2818_v63  ;;  %2047 = vmatmul.msk.f32.gmra.mxu0 %vm227_vm1, %v2027_v47 }
  0xcd   : > { %v2824_v35 = vadd.f32 %v915_v0, %v801_v19  ;;  %1971 = vmatmul.msk.f32.gmra.mxu2 %vm227_vm1, %v2821_v8  ;;  %2145 = vmatmul.msk.f32.gmra.mxu3 %vm227_vm1, %v2527_v23 }
  0xd0   : > { %v582_v28 = vpop.f32.mrf.mxu2  ;;  %v756_v19 = vpop.f32.mrf.mxu3 }
  0xd1   : > { %v634_v39 = vadd.f32 %v582_v28, %v435_v18  ;;  %v437_v40 = vpop.f32.mrf.mxu1  ;;  %v921_v14 = vpop.f32.mrf.mxu0 }
  0xd2   : > { %v438_v23 = vadd.f32 %v437_v40, %v2748_v52 }
  0xd3   : > { %v802_v0 = vadd.f32 %v750_v12, %v634_v39 }
  0xd4   : > { %2068 = vmatmul.msk.f32.vlgmr.msra.gmra.mxu1 %vm227_vm1, %v2048_v55  ;;  %2182 = vmatmul.msk.f32.vlgmr.msra.gmra.mxu0 %vm227_vm1, %v2574_v38 }
  0xd5   : > { %v2835_v51 = vadd.f32 %v918_v48, %v802_v0  ;;  %2106 = vmatmul.msk.f32.vlgmr.msra.gmra.mxu2 %vm227_vm1, %v2571_v37  ;;  %2146 = vmatmul.msk.f32.gmra.mxu3 %vm227_vm1, %v2544_v27 }
  0xd8   : > { %v585_v36 = vpop.f32.mrf.mxu2  ;;  %v759_v48 = vpop.f32.mrf.mxu3 }
  0xd9   : > { %v635_v47 = vadd.f32 %v585_v36, %v438_v23  ;;  %v440_v12 = vpop.f32.mrf.mxu1  ;;  %v924_v18 = vpop.f32.mrf.mxu0 }
  0xda   : > { %v441_v27 = vadd.f32 %v440_v12, %v2770_v4  ;;  %v2052_v12 = vld [vmem:[%s2448_s19 + $0x211] sm:$0xff] }
  0xdb   : > { %v803_v3 = vadd.f32 %v753_v29, %v635_v47  ;;  %v2050_v29 = vld [vmem:[%s2448_s19 + $0x1f9] sm:$0xff] }
  0xdc   : > { %2069 = vmatmul.msk.f32.gmra.mxu1 %vm227_vm1, %v2049_v13  ;;  %2183 = vmatmul.msk.f32.gmra.mxu0 %vm227_vm1, %v2588_v42 }
  0xdd   : > { %v2846_v28 = vadd.f32 %v921_v14, %v803_v3  ;;  %2107 = vmatmul.msk.f32.gmra.mxu2 %vm227_vm1, %v2585_v41  ;;  %2147 = vmatmul.msk.f32.gmra.mxu3 %vm227_vm1, %v2451_v5 }
  0xe0   : > { %v588_v37 = vpop.f32.mrf.mxu2  ;;  %v762_v39 = vpop.f32.mrf.mxu3 }
  0xe1   : > { %v636_v38 = vadd.f32 %v588_v37, %v441_v27  ;;  %v443_v52 = vpop.f32.mrf.mxu1  ;;  %v927_v55 = vpop.f32.mrf.mxu0  ;;  %v2053_v27 = vld [vmem:[%s2448_s19 + $0x219] sm:$0xff] }
  0xe2   : > { %v444_v5 = vadd.f32 %v443_v52, %v2790_v56 }
  0xe3   : > { %v804_v40 = vadd.f32 %v756_v19, %v636_v38  ;;  %v2051_v19 = vld [vmem:[%s2448_s19 + $0x201] sm:$0xff] }
  0xe4   : > { %2070 = vmatmul.msk.f32.gmra.mxu1 %vm227_vm1, %v2050_v29  ;;  %2184 = vmatmul.msk.f32.gmra.mxu0 %vm227_vm1, %v2602_v46 }
  0xe5   : > { %v2857_v0 = vadd.f32 %v924_v18, %v804_v40  ;;  %2108 = vmatmul.msk.f32.gmra.mxu2 %vm227_vm1, %v2599_v45  ;;  %2148 = vmatmul.msk.f32.gmra.mxu3 %vm227_vm1, %v2468_v9 }
  0xe8   : > { %v591_v41 = vpop.f32.mrf.mxu2  ;;  %v765_v14 = vpop.f32.mrf.mxu3 }
  0xe9   : > { %v637_v42 = vadd.f32 %v591_v41, %v444_v5  ;;  %v446_v4 = vpop.f32.mrf.mxu1  ;;  %v930_v36 = vpop.f32.mrf.mxu0 }
  0xea   : > { %v447_v9 = vadd.f32 %v446_v4, %v2696_v15 }
  0xeb   : > { %v805_v23 = vadd.f32 %v759_v48, %v637_v42  ;;  %v2055_v42 = vld [vmem:[%s2448_s19 + $0x231] sm:$0xff] }
  0xec   : > { %2071 = vmatmul.msk.f32.gmra.mxu1 %vm227_vm1, %v2051_v19  ;;  %2185 = vmatmul.msk.f32.gmra.mxu0 %vm227_vm1, %v2616_v50 }
  0xed   : > { %v2868_v47 = vadd.f32 %v927_v55, %v805_v23  ;;  %2109 = vmatmul.msk.f32.gmra.mxu2 %vm227_vm1, %v2613_v49  ;;  %2149 = vmatmul.msk.f32.gmra.mxu3 %vm227_vm1, %v2497_v16 }
  0xf0   : > { %v594_v45 = vpop.f32.mrf.mxu2  ;;  %v768_v13 = vpop.f32.mrf.mxu3 }
  0xf1   : > { %v638_v46 = vadd.f32 %v594_v45, %v447_v9  ;;  %v449_v56 = vpop.f32.mrf.mxu1  ;;  %v933_v3 = vpop.f32.mrf.mxu0 }
  0xf2   : > { %v450_v16 = vadd.f32 %v449_v56, %v2716_v32 }
  0xf3   : > { %v806_v48 = vadd.f32 %v762_v39, %v638_v46  ;;  %v2054_v39 = vld [vmem:[%s2448_s19 + $0x229] sm:$0xff] }
  0xf4   : > { %2072 = vmatmul.msk.f32.gmra.mxu1 %vm227_vm1, %v2052_v12  ;;  %2186 = vmatmul.msk.f32.gmra.mxu0 %vm227_vm1, %v2630_v54  ;;  %v2057_v12 = vld [vmem:[%s2448_s19 + $0x249] sm:$0xff] }
  0xf5   : > { %v2879_v18 = vadd.f32 %v930_v36, %v806_v48  ;;  %2110 = vmatmul.msk.f32.gmra.mxu2 %vm227_vm1, %v2627_v53  ;;  %2150 = vmatmul.msk.f32.gmra.mxu3 %vm227_vm1, %v2521_v21  ;;  %v2056_v36 = vld [vmem:[%s2448_s19 + $0x241] sm:$0xff] }
  0xf8   : > { %v597_v49 = vpop.f32.mrf.mxu2  ;;  %v771_v37 = vpop.f32.mrf.mxu3 }
  0xf9   : > { %v639_v50 = vadd.f32 %v597_v49, %v450_v16  ;;  %v452_v15 = vpop.f32.mrf.mxu1  ;;  %v936_v52 = vpop.f32.mrf.mxu0  ;;  %v2058_v49 = vld [vmem:[%s2448_s19 + $0x259] sm:$0xff] }
  0xfa   : > { %v453_v21 = vadd.f32 %v452_v15, %v2738_v44 }
  0xfb   : > { %v807_v38 = vadd.f32 %v765_v14, %v639_v50 }
  0xfc   : > { %2073 = vmatmul.msk.f32.gmra.mxu1 %vm227_vm1, %v2053_v27  ;;  %2187 = vmatmul.msk.f32.gmra.mxu0 %vm227_vm1, %v2644_v58 }
  0xfd   : > { %v2890_v29 = vadd.f32 %v933_v3, %v807_v38  ;;  %2111 = vmatmul.msk.f32.gmra.mxu2 %vm227_vm1, %v2641_v57  ;;  %2151 = vmatmul.msk.f32.gmra.mxu3 %vm227_vm1, %v2538_v25  ;;  %v2059_v38 = vld [vmem:[%s2448_s19 + $0x261] sm:$0xff] }
 0x100   : > { %v600_v53 = vpop.f32.mrf.mxu2  ;;  %v774_v40 = vpop.f32.mrf.mxu3 }
 0x101   : > { %v640_v54 = vadd.f32 %v600_v53, %v453_v21  ;;  %v455_v32 = vpop.f32.mrf.mxu1  ;;  %v939_v5 = vpop.f32.mrf.mxu0 }
 0x102   : > { %v456_v25 = vadd.f32 %v455_v32, %v2760_v60  ;;  %v3147_v32 = vld [vmem:[#allocation5_spill] sm:$0xff] }
 0x103   : > { %v808_v55 = vadd.f32 %v768_v13, %v640_v54 }
 0x104   : > { %2074 = vmatmul.msk.f32.gmra.mxu1 %vm227_vm1, %v2054_v39  ;;  %2188 = vmatmul.msk.f32.gmra.mxu0 %vm227_vm1, %v2658_v62 }
 0x105   : > { %v2901_v41 = vadd.f32 %v936_v52, %v808_v55  ;;  %2112 = vmatmul.msk.f32.gmra.mxu2 %vm227_vm1, %v2655_v61  ;;  %2152 = vmatmul.msk.f32.gmra.mxu3 %vm227_vm1, %v2454_v6 }
 0x108   : > { %v603_v57 = vpop.f32.mrf.mxu2  ;;  %v777_v4 = vpop.f32.mrf.mxu3 }
 0x109   : > { %v641_v58 = vadd.f32 %v603_v57, %v456_v25  ;;  %v458_v44 = vpop.f32.mrf.mxu1  ;;  %v942_v14 = vpop.f32.mrf.mxu0 }
 0x10a   : > { %v459_v6 = vadd.f32 %v458_v44, %v2782_v30 }
 0x10b   : > { %v809_v19 = vadd.f32 %v771_v37, %v641_v58 }
 0x10c   : > { %2075 = vmatmul.msk.f32.gmra.mxu1 %vm227_vm1, %v2055_v42  ;;  %2189 = vmatmul.msk.f32.gmra.mxu0 %vm227_vm1, %v2672_v2  ;;  %v3148_v42 = vld [vmem:[#allocation12_spill] sm:$0xff] }
 0x10d   : > { %v2912_v23 = vadd.f32 %v939_v5, %v809_v19  ;;  %2113 = vmatmul.msk.f32.gmra.mxu2 %vm227_vm1, %v2669_v1  ;;  %2153 = vmatmul.msk.f32.gmra.mxu3 %vm227_vm1, %v2471_v10  ;;  %v2060_v5 = vld [vmem:[%s2448_s19 + $0x271] sm:$0xff] }
 0x10e   : > { %v3150_v19 = vld [vmem:[#allocation18_spill] sm:$0xff] }
 0x110   : > { %v606_v61 = vpop.f32.mrf.mxu2  ;;  %v780_v9 = vpop.f32.mrf.mxu3 }
 0x111   : > { %v642_v62 = vadd.f32 %v606_v61, %v459_v6  ;;  %v461_v60 = vpop.f32.mrf.mxu1  ;;  %v945_v46 = vpop.f32.mrf.mxu0  ;;  %v3151_v6 = vld [vmem:[#allocation6_spill] sm:$0xff] }
 0x112   : > { %v462_v10 = vadd.f32 %v461_v60, %v2714_v31 }
 0x113   : > { %v810_v45 = vadd.f32 %v774_v40, %v642_v62 }
 0x114   : > { %2076 = vmatmul.msk.f32.gmra.mxu1 %vm227_vm1, %v2056_v36  ;;  %2190 = vmatmul.msk.f32.gmra.mxu0 %vm227_vm1, %v2686_v11  ;;  %v2061_v36 = vld [vmem:[%s2448_s19 + $0x279] sm:$0xff] }
 0x115   : > { %v2923_v56 = vadd.f32 %v942_v14, %v810_v45  ;;  %2114 = vmatmul.msk.f32.gmra.mxu2 %vm227_vm1, %v2683_v7  ;;  %2154 = vmatmul.msk.f32.gmra.mxu3 %vm227_vm1, %v2500_v17 }
 0x118   : > { %v609_v1 = vpop.f32.mrf.mxu2  ;;  %v783_v13 = vpop.f32.mrf.mxu3 }
 0x119   : > { %v643_v2 = vadd.f32 %v609_v1, %v462_v10  ;;  %v464_v30 = vpop.f32.mrf.mxu1  ;;  %v948_v3 = vpop.f32.mrf.mxu0  ;;  %v3152_v1 = vld [vmem:[#allocation16_spill] sm:$0xff] }
 0x11a   : > { %v465_v17 = vadd.f32 %v464_v30, %v2736_v43  ;;  %v3154_v30 = vld [vmem:[#allocation8_spill] sm:$0xff] }
 0x11b   : > { %v811_v48 = vadd.f32 %v777_v4, %v643_v2  ;;  %v3149_v4 = vld [vmem:[#allocation13_spill] sm:$0xff] }
 0x11c   : > { %2077 = vmatmul.msk.f32.gmra.mxu1 %vm227_vm1, %v2057_v12  ;;  %2191 = vmatmul.msk.f32.gmra.mxu0 %vm227_vm1, %v2702_v24  ;;  %v3153_v2 = vld [vmem:[#allocation17_spill] sm:$0xff] }
 0x11d   : > { %v2934_v16 = vadd.f32 %v945_v46, %v811_v48  ;;  %2115 = vmatmul.msk.f32.gmra.mxu2 %vm227_vm1, %v2699_v20  ;;  %2155 = vmatmul.msk.f32.gmra.mxu3 %vm227_vm1, %v2524_v22 }
 0x120   : > { %v612_v7 = vpop.f32.mrf.mxu2  ;;  %v786_v50 = vpop.f32.mrf.mxu3 }
 0x121   : > { %v644_v11 = vadd.f32 %v612_v7, %v465_v17  ;;  %v467_v31 = vpop.f32.mrf.mxu1  ;;  %v951_v27 = vpop.f32.mrf.mxu0  ;;  %v2062_v7 = vld [vmem:[%s2448_s19 + $0x289] sm:$0xff] }
 0x122   : > { %v468_v22 = vadd.f32 %v467_v31, %v2758_v59  ;;  %v3146_v59 = vld [vmem:[#allocation15_spill] sm:$0xff] }
 0x123   : > { %v812_v15 = vadd.f32 %v780_v9, %v644_v11 }
 0x124   : > { %2078 = vmatmul.msk.f32.gmra.mxu1 %vm227_vm1, %v2058_v49  ;;  %2192 = vmatmul.msk.f32.gmra.mxu0 %vm227_vm1, %v2722_v34  ;;  %v3145_v34 = vld [vmem:[#allocation10_spill] sm:$0xff] }
 0x125   : > { %v2945_v37 = vadd.f32 %v948_v3, %v812_v15  ;;  %2116 = vmatmul.msk.f32.gmra.mxu2 %vm227_vm1, %v2719_v33  ;;  %2156 = vmatmul.msk.f32.gmra.mxu3 %vm227_vm1, %v2541_v26  ;;  %v3144_v33 = vld [vmem:[#allocation9_spill] sm:$0xff] }
 0x128   : > { %v615_v20 = vpop.f32.mrf.mxu2  ;;  %v789_v52 = vpop.f32.mrf.mxu3 }
 0x129   : > { %v645_v24 = vadd.f32 %v615_v20, %v468_v22  ;;  %v470_v43 = vpop.f32.mrf.mxu1  ;;  %v954_v53 = vpop.f32.mrf.mxu0  ;;  %v3157_v22 = vld [vmem:[#allocation20_spill] sm:$0xff]  ;;  %v3158_v20 = vld [vmem:[#allocation11_spill] sm:$0xff] }
 0x12a   : > { %v471_v26 = vadd.f32 %v470_v43, %v3146_v59  ;;  %v2141_v59 = vld [vmem:[%s2448_s19 + $0x1d0] sm:$0xff] }
 0x12b   : > { %v813_v21 = vadd.f32 %v783_v13, %v645_v24  ;;  %v3155_v13 = vld [vmem:[#allocation7_spill] sm:$0xff] }
 0x12c   : > { %2079 = vmatmul.msk.f32.gmra.mxu1 %vm227_vm1, %v2059_v38  ;;  %2193 = vmatmul.msk.f32.gmra.mxu0 %vm227_vm1, %v3145_v34 }
 0x12d   : > { %v2956_v54 = vadd.f32 %v951_v27, %v813_v21  ;;  %2117 = vmatmul.msk.f32.gmra.mxu2 %vm227_vm1, %v3144_v33  ;;  %2157 = vmatmul.msk.f32.gmra.mxu3 %vm227_vm1, %v3147_v32  ;;  %v3156_v27 = vld [vmem:[#allocation19_spill] sm:$0xff]  ;;  %v2063_v21 = vld [vmem:[%s2448_s19 + $0x291] sm:$0xff] }
 0x12e   : > { %v3159_v32 = vld [vmem:[#allocation14_spill] sm:$0xff] }
 0x130   : > { %v618_v39 = vpop.f32.mrf.mxu2  ;;  %v792_v25 = vpop.f32.mrf.mxu3 }
 0x131   : > { %v646_v40 = vadd.f32 %v618_v39, %v471_v26  ;;  %v473_v55 = vpop.f32.mrf.mxu1  ;;  %v957_v58 = vpop.f32.mrf.mxu0 }
 0x132   : > { %v474_v14 = vadd.f32 %v473_v55, %v3150_v19  ;;  %v2178_v19 = vld [vmem:[%s2448_s19 + $0xd9] sm:$0xff] }
 0x133   : > { %v814_v57 = vadd.f32 %v786_v50, %v646_v40  ;;  %v2140_v50 = vld [vmem:[%s2448_s19 + $0x1c8] sm:$0xff] }
 0x134   : > { %2080 = vmatmul.msk.f32.gmra.mxu1 %vm227_vm1, %v2060_v5  ;;  %2194 = vmatmul.msk.f32.gmra.mxu0 %vm227_vm1, %v3149_v4 }
 0x135   : > { %v2967_v44 = vadd.f32 %v954_v53, %v814_v57  ;;  %2118 = vmatmul.msk.f32.gmra.mxu2 %vm227_vm1, %v3148_v42  ;;  %2158 = vmatmul.msk.f32.gmra.mxu3 %vm227_vm1, %v3151_v6  ;;  %v2102_v57 = vld [vmem:[%s2448_s19 + $0xd8] sm:$0xff] }
 0x138   : > { %v621_v61 = vpop.f32.mrf.mxu2  ;;  %v795_v9 = vpop.f32.mrf.mxu3 }
 0x139   : > { %v647_v62 = vadd.f32 %v621_v61, %v474_v14  ;;  %v476_v60 = vpop.f32.mrf.mxu1  ;;  %v960_v46 = vpop.f32.mrf.mxu0 }
 0x13a   : > { %v477_v12 = vadd.f32 %v476_v60, %v3154_v30  ;;  %v2103_v60 = vld [vmem:[%s2448_s19 + $0xe0] sm:$0xff] }
 0x13b   : > { %v815_v45 = vadd.f32 %v789_v52, %v647_v62  ;;  %v2065_v62 = vld [vmem:[%s2448_s19 + $0x2a9] sm:$0xff] }
 0x13c   : > { %2081 = vmatmul.msk.f32.gmra.mxu1 %vm227_vm1, %v2061_v36  ;;  %2195 = vmatmul.msk.f32.gmra.mxu0 %vm227_vm1, %v3153_v2 }
 0x13d   : > { %v2978_v10 = vadd.f32 %v957_v58, %v815_v45  ;;  %2119 = vmatmul.msk.f32.gmra.mxu2 %vm227_vm1, %v3152_v1  ;;  %2159 = vmatmul.msk.f32.gmra.mxu3 %vm227_vm1, %v3155_v13  ;;  %v2179_v45 = vld [vmem:[%s2448_s19 + $0xe1] sm:$0xff] }
 0x140   : > { %v624_v48 = vpop.f32.mrf.mxu2  ;;  %v798_v11 = vpop.f32.mrf.mxu3 }
 0x141   : > { %v648_v3 = vadd.f32 %v624_v48, %v477_v12  ;;  %v479_v17 = vpop.f32.mrf.mxu1  ;;  %v963_v49 = vpop.f32.mrf.mxu0 }
 0x142   : > { %v480_v24 = vadd.f32 %v479_v17, %v3158_v20 }
 0x143   : > { %v816_v31 = vadd.f32 %v792_v25, %v648_v3  ;;  %v2064_v25 = vld [vmem:[%s2448_s19 + $0x2a1] sm:$0xff]  ;;  %s177_s19 = scalar_lea.vmem [#allocation2], %s1893_s8 }
 0x144   : > { %2082 = vmatmul.msk.f32.gmra.mxu1 %vm227_vm1, %v2062_v7  ;;  %2196 = vmatmul.msk.f32.gmra.mxu0 %vm227_vm1, %v3157_v22  ;;  %s1798_s21 = sshll.u32 %s177_s19, 4  ;;  %s1799_s21 = int_to_ptr.vmem [resolvable:$true] %s1798_s21 }
 0x145   : > { %v2990_v15 = vadd.f32 %v960_v46, %v816_v31  ;;  %2120 = vmatmul.msk.f32.gmra.mxu2 %vm227_vm1, %v3156_v27  ;;  %2160 = vmatmul.msk.f32.gmra.mxu3 %vm227_vm1, %v2140_v50 }
 0x148   : > { %v627_v43 = vpop.f32.mrf.mxu2  ;;  %v1418_v53 = vpop.f32.mrf.mxu3 }
 0x149   : > { %v649_v38 = vadd.f32 %v627_v43, %v480_v24  ;;  %v482_v52 = vpop.f32.mrf.mxu1  ;;  %v966_v34 = vpop.f32.mrf.mxu0 }
 0x14a   : > { %v483_v39 = vadd.f32 %v482_v52, %v3159_v32 }
 0x14b   : > { %v817_v33 = vadd.f32 %v795_v9, %v649_v38 }
 0x14c   : > { %2083 = vmatmul.msk.f32.gmra.mxu1 %vm227_vm1, %v2063_v21  ;;  %2197 = vmatmul.msk.f32.gmra.mxu0 %vm227_vm1, %v2821_v8 }
 0x14d   : > { %v3001_v26 = vadd.f32 %v963_v49, %v817_v33  ;;  %2121 = vmatmul.msk.f32.gmra.mxu2 %vm227_vm1, %v2818_v63  ;;  %2161 = vmatmul.msk.f32.gmra.mxu3 %vm227_vm1, %v2141_v59 }
 0x150   : > { %v630_v40 = vpop.f32.mrf.mxu2  ;;  %v1421_v58 = vpop.f32.mrf.mxu3 }
 0x151   : > { %v650_v55 = vadd.f32 %v630_v40, %v483_v39  ;;  %v1081_v5 = vpop.f32.mrf.mxu1  ;;  %v1584_v4 = vpop.f32.mrf.mxu0 }
 0x152   : > { %v1135_v8 = vadd.f32 %v1081_v5, %v2824_v35  ;;  %v3029_v35 = vld [vmem:[%s3113_s2] ss:$0 sm:$0xff] }
 0x153   : > { %v818_v42 = vadd.f32 %v798_v11, %v650_v55 }
 0x154   : > { %2084 = vmatmul.msk.f32.gmra.mxu1 %vm227_vm1, %v2064_v25  ;;  %2198 = vmatmul.msk.f32.gmra.mxu0 %vm227_vm1, %v2178_v19 }
 0x155   : > { %v3013_v63 = vadd.f32 %v966_v34, %v818_v42  ;;  %2122 = vmatmul.msk.f32.gmra.mxu2 %vm227_vm1, %v2102_v57 }
 0x158   : > { %v1250_v14 = vpop.f32.mrf.mxu2  ;;  %v1424_v36 = vpop.f32.mrf.mxu3 }
 0x159   : > { %v1304_v6 = vadd.f32 %v1250_v14, %v1135_v8  ;;  %v1084_v61 = vpop.f32.mrf.mxu1  ;;  %v1587_v9 = vpop.f32.mrf.mxu0 }
 0x15a   : > { %v1136_v1 = vadd.f32 %v1084_v61, %v2835_v51 }
 0x15b   : > { %v1472_v46 = vadd.f32 %v1418_v53, %v1304_v6 }
 0x15c   : > { %2085 = vmatmul.msk.f32.gmra.mxu1 %vm227_vm1, %v2065_v62  ;;  %2199 = vmatmul.msk.f32.gmra.mxu0 %vm227_vm1, %v2179_v45 }
 0x15d   : > { %2123 = vmatmul.msk.f32.gmra.mxu2 %vm227_vm1, %v2103_v60  ;;  %v1638_v30 = vadd.f32 %v1584_v4, %v1472_v46 }
 0x15f   : > { %v1660_v7 = vadd.f32 %v3029_v35, %v1638_v30 }
 0x160   : > { %v1253_v2 = vpop.f32.mrf.mxu2  ;;  %v1427_v48 = vpop.f32.mrf.mxu3 }
 0x161   : > { %v1305_v12 = vadd.f32 %v1253_v2, %v1136_v1  ;;  %v1087_v13 = vpop.f32.mrf.mxu1  ;;  %v1590_v17 = vpop.f32.mrf.mxu0  ;;  %v1697_v50 = vrot.slane %v1660_v7, 1 }
 0x162   : > { %v1137_v31 = vadd.f32 %v1087_v13, %v2846_v28 }
 0x163   : > { %v1473_v3 = vadd.f32 %v1421_v58, %v1305_v12 }
 0x165   : > { %v1639_v11 = vadd.f32 %v1587_v9, %v1473_v3 }
 0x167   : > { %v1661_v49 = vadd.f32 %v3029_v35, %v1639_v11 }
 0x168   : > { %v1256_v51 = vpop.f32.mrf.mxu2  ;;  %v1430_v24 = vpop.f32.mrf.mxu3 }
 0x169   : > { %v1698_v27 = vrot.slane %v1661_v49, 1  ;;  %v1306_v22 = vadd.f32 %v1256_v51, %v1137_v31  ;;  %v1090_v20 = vpop.f32.mrf.mxu1  ;;  %v1593_v43 = vpop.f32.mrf.mxu0 }
 0x16a   : > { %v1138_v53 = vadd.f32 %v1090_v20, %v2857_v0 }
 0x16b   : > { %v1699_v38 = vsel %vm1696_vm2, %v1697_v50, %v1698_v27  ;;  %v1474_v21 = vadd.f32 %v1424_v36, %v1306_v22 }
 0x16c   : > { %v1733_v52 = vmax.f32 %v1660_v7, %v1699_v38 }
 0x16d   : > { %v1640_v34 = vadd.f32 %v1590_v17, %v1474_v21 }
 0x16f   : > { %v1662_v55 = vadd.f32 %v3029_v35, %v1640_v34 }
 0x170   : > { %v1259_v33 = vpop.f32.mrf.mxu2  ;;  %v1433_v32 = vpop.f32.mrf.mxu3 }
 0x171   : > { %v1307_v59 = vadd.f32 %v1259_v33, %v1138_v53  ;;  %v1093_v28 = vpop.f32.mrf.mxu1  ;;  %v1596_v40 = vpop.f32.mrf.mxu0  ;;  %v1700_v42 = vrot.slane %v1662_v55, 1 }
 0x172   : > { %v1139_v25 = vadd.f32 %v1093_v28, %v2868_v47 }
 0x173   : > { %v1475_v39 = vadd.f32 %v1427_v48, %v1307_v59 }
 0x175   : > { %v1641_v5 = vadd.f32 %v1593_v43, %v1475_v39 }
 0x177   : > { %v1663_v57 = vadd.f32 %v3029_v35, %v1641_v5 }
 0x178   : > { %v1262_v58 = vpop.f32.mrf.mxu2  ;;  %v1436_v0 = vpop.f32.mrf.mxu3 }
 0x179   : > { %v1701_v4 = vrot.slane %v1663_v57, 1  ;;  %v1308_v19 = vadd.f32 %v1262_v58, %v1139_v25  ;;  %v1096_v8 = vpop.f32.mrf.mxu1  ;;  %v1599_v6 = vpop.f32.mrf.mxu0 }
 0x17a   : > { %v1140_v36 = vadd.f32 %v1096_v8, %v2879_v18 }
 0x17b   : > { %v1702_v14 = vsel %vm1696_vm2, %v1700_v42, %v1701_v4  ;;  %v1476_v62 = vadd.f32 %v1430_v24, %v1308_v19 }
 0x17c   : > { %v1734_v61 = vmax.f32 %v1662_v55, %v1702_v14 }
 0x17d   : > { %v1642_v45 = vadd.f32 %v1596_v40, %v1476_v62 }
 0x17e   : > { %v1742_v60 = vmax.f32 %v1733_v52, %v1734_v61 }
 0x17f   : > { %v1664_v12 = vadd.f32 %v3029_v35, %v1642_v45 }
 0x180   : > { %v1265_v9 = vpop.f32.mrf.mxu2  ;;  %1750 = vxpose.xlu0.b32.start [1/8] (short) (narrow) %v1742_v60, 8  ;;  %v1439_v1 = vpop.f32.mrf.mxu3 }
 0x181   : > { %v1309_v47 = vadd.f32 %v1265_v9, %v1140_v36  ;;  %v1099_v46 = vpop.f32.mrf.mxu1  ;;  %v1602_v30 = vpop.f32.mrf.mxu0  ;;  %v1703_v7 = vrot.slane %v1664_v12, 1 }
 0x182   : > { %v1141_v48 = vadd.f32 %v1099_v46, %v2890_v29 }
 0x183   : > { %v1477_v2 = vadd.f32 %v1433_v32, %v1309_v47 }
 0x185   : > { %v1643_v13 = vadd.f32 %v1599_v6, %v1477_v2 }
 0x187   : > { %v1665_v3 = vadd.f32 %v3029_v35, %v1643_v13 }
 0x188   : > { %v1268_v17 = vpop.f32.mrf.mxu2  ;;  %v1442_v49 = vpop.f32.mrf.mxu3 }
 0x189   : > { %v1704_v11 = vrot.slane %v1665_v3, 1  ;;  %v1310_v31 = vadd.f32 %v1268_v17, %v1141_v48  ;;  %v1102_v18 = vpop.f32.mrf.mxu1  ;;  %v1605_v50 = vpop.f32.mrf.mxu0 }
 0x18a   : > { %v1142_v24 = vadd.f32 %v1102_v18, %v2901_v41 }
 0x18b   : > { %v1705_v51 = vsel %vm1696_vm2, %v1703_v7, %v1704_v11  ;;  %v1478_v22 = vadd.f32 %v1436_v0, %v1310_v31 }
 0x18c   : > { %v1735_v27 = vmax.f32 %v1664_v12, %v1705_v51 }
 0x18d   : > { %v1644_v38 = vadd.f32 %v1602_v30, %v1478_v22 }
 0x18e   : > { %v1743_v20 = vmax.f32 %v1734_v61, %v1735_v27 }
 0x18f   : > { %v1666_v34 = vadd.f32 %v3029_v35, %v1644_v38 }
 0x190   : > { %v1271_v43 = vpop.f32.mrf.mxu2  ;;  %1751 = vxpose.xlu0.b32.cont [2/8] (short) (narrow) %v1743_v20, 8  ;;  %v1445_v21 = vpop.f32.mrf.mxu3 }
 0x191   : > { %v1311_v29 = vadd.f32 %v1271_v43, %v1142_v24  ;;  %v1105_v52 = vpop.f32.mrf.mxu1  ;;  %v1608_v33 = vpop.f32.mrf.mxu0  ;;  %v1706_v40 = vrot.slane %v1666_v34, 1 }
 0x192   : > { %v1143_v28 = vadd.f32 %v1105_v52, %v2912_v23 }
 0x193   : > { %v1479_v53 = vadd.f32 %v1439_v1, %v1311_v29 }
 0x195   : > { %v1645_v59 = vadd.f32 %v1605_v50, %v1479_v53 }
 0x197   : > { %v1667_v32 = vadd.f32 %v3029_v35, %v1645_v59 }
 0x198   : > { %v1274_v39 = vpop.f32.mrf.mxu2  ;;  %v1448_v25 = vpop.f32.mrf.mxu3 }
 0x199   : > { %v1707_v55 = vrot.slane %v1667_v32, 1  ;;  %v1312_v5 = vadd.f32 %v1274_v39, %v1143_v28  ;;  %v1108_v41 = vpop.f32.mrf.mxu1  ;;  %v1611_v58 = vpop.f32.mrf.mxu0 }
 0x19a   : > { %v1144_v8 = vadd.f32 %v1108_v41, %v2923_v56 }
 0x19b   : > { %v1708_v57 = vsel %vm1696_vm2, %v1706_v40, %v1707_v55  ;;  %v1480_v4 = vadd.f32 %v1442_v49, %v1312_v5 }
 0x19c   : > { %v1736_v42 = vmax.f32 %v1666_v34, %v1708_v57 }
 0x19d   : > { %v1646_v14 = vadd.f32 %v1608_v33, %v1480_v4 }
 0x19e   : > { %v1744_v19 = vmax.f32 %v1735_v27, %v1736_v42 }
 0x19f   : > { %v1668_v36 = vadd.f32 %v3029_v35, %v1646_v14 }
 0x1a0   : > { %v1277_v0 = vpop.f32.mrf.mxu2  ;;  %1752 = vxpose.xlu0.b32.cont [3/8] (short) (narrow) %v1744_v19, 8  ;;  %v1451_v60 = vpop.f32.mrf.mxu3 }
 0x1a1   : > { %v1313_v23 = vadd.f32 %v1277_v0, %v1144_v8  ;;  %v1111_v6 = vpop.f32.mrf.mxu1  ;;  %v1614_v62 = vpop.f32.mrf.mxu0  ;;  %v1709_v1 = vrot.slane %v1668_v36, 1 }
 0x1a2   : > { %v1145_v45 = vadd.f32 %v1111_v6, %v2934_v16 }
 0x1a3   : > { %v1481_v61 = vadd.f32 %v1445_v21, %v1313_v23 }
 0x1a5   : > { %v1647_v9 = vadd.f32 %v1611_v58, %v1481_v61 }
 0x1a7   : > { %v1669_v47 = vadd.f32 %v3029_v35, %v1647_v9 }
 0x1a8   : > { %v1280_v46 = vpop.f32.mrf.mxu2  ;;  %v1454_v7 = vpop.f32.mrf.mxu3 }
 0x1a9   : > { %v1710_v2 = vrot.slane %v1669_v47, 1  ;;  %v1314_v30 = vadd.f32 %v1280_v46, %v1145_v45  ;;  %v1114_v56 = vpop.f32.mrf.mxu1  ;;  %v1617_v13 = vpop.f32.mrf.mxu0 }
 0x1aa   : > { %v1146_v11 = vadd.f32 %v1114_v56, %v2945_v37 }
 0x1ab   : > { %v1711_v12 = vsel %vm1696_vm2, %v1709_v1, %v1710_v2  ;;  %v1482_v3 = vadd.f32 %v1448_v25, %v1314_v30 }
 0x1ac   : > { %v1737_v48 = vmax.f32 %v1668_v36, %v1711_v12 }
 0x1ad   : > { %v1648_v18 = vadd.f32 %v1614_v62, %v1482_v3 }
 0x1ae   : > { %v1745_v17 = vmax.f32 %v1736_v42, %v1737_v48 }
 0x1af   : > { %v1670_v27 = vadd.f32 %v3029_v35, %v1648_v18 }
 0x1b0   : > { %v1283_v31 = vpop.f32.mrf.mxu2  ;;  %1753 = vxpose.xlu0.b32.cont [4/8] (short) (narrow) %v1745_v17, 8  ;;  %v1457_v38 = vpop.f32.mrf.mxu3 }
 0x1b1   : > { %v1315_v16 = vadd.f32 %v1283_v31, %v1146_v11  ;;  %v1117_v49 = vpop.f32.mrf.mxu1  ;;  %v1620_v50 = vpop.f32.mrf.mxu0  ;;  %v1712_v29 = vrot.slane %v1670_v27, 1 }
 0x1b2   : > { %v1147_v20 = vadd.f32 %v1117_v49, %v2956_v54 }
 0x1b3   : > { %v1483_v51 = vadd.f32 %v1451_v60, %v1315_v16 }
 0x1b5   : > { %v1649_v22 = vadd.f32 %v1617_v13, %v1483_v51 }
 0x1b7   : > { %v1671_v24 = vadd.f32 %v3029_v35, %v1649_v22 }
 0x1b8   : > { %v1286_v43 = vpop.f32.mrf.mxu2  ;;  %v1460_v5 = vpop.f32.mrf.mxu3 }
 0x1b9   : > { %v1713_v52 = vrot.slane %v1671_v24, 1  ;;  %v1316_v21 = vadd.f32 %v1286_v43, %v1147_v20  ;;  %v1120_v37 = vpop.f32.mrf.mxu1  ;;  %v1623_v33 = vpop.f32.mrf.mxu0 }
 0x1ba   : > { %v1148_v32 = vadd.f32 %v1120_v37, %v2967_v44 }
 0x1bb   : > { %v1714_v53 = vsel %vm1696_vm2, %v1712_v29, %v1713_v52  ;;  %v1484_v59 = vadd.f32 %v1454_v7, %v1316_v21 }
 0x1bc   : > { %v1738_v34 = vmax.f32 %v1670_v27, %v1714_v53 }
 0x1bd   : > { %v1650_v40 = vadd.f32 %v1620_v50, %v1484_v59 }
 0x1be   : > { %v1746_v28 = vmax.f32 %v1737_v48, %v1738_v34 }
 0x1bf   : > { %v1672_v57 = vadd.f32 %v3029_v35, %v1650_v40 }
 0x1c0   : > { %v1289_v39 = vpop.f32.mrf.mxu2  ;;  %1754 = vxpose.xlu0.b32.cont [5/8] (short) (narrow) %v1746_v28, 8  ;;  %v1463_v61 = vpop.f32.mrf.mxu3 }
 0x1c1   : > { %v1317_v54 = vadd.f32 %v1289_v39, %v1148_v32  ;;  %v1123_v55 = vpop.f32.mrf.mxu1  ;;  %v1626_v25 = vpop.f32.mrf.mxu0  ;;  %v1715_v8 = vrot.slane %v1672_v57, 1 }
 0x1c2   : > { %v1149_v42 = vadd.f32 %v1123_v55, %v2978_v10 }
 0x1c3   : > { %v1485_v41 = vadd.f32 %v1457_v38, %v1317_v54 }
 0x1c5   : > { %v1651_v58 = vadd.f32 %v1623_v33, %v1485_v41 }
 0x1c7   : > { %v1673_v4 = vadd.f32 %v3029_v35, %v1651_v58 }
 0x1c8   : > { %v1292_v19 = vpop.f32.mrf.mxu2  ;;  %v1466_v56 = vpop.f32.mrf.mxu3 }
 0x1c9   : > { %v1716_v0 = vrot.slane %v1673_v4, 1  ;;  %v1318_v14 = vadd.f32 %v1292_v19, %v1149_v42  ;;  %v1126_v44 = vpop.f32.mrf.mxu1  ;;  %v1629_v36 = vpop.f32.mrf.mxu0 }
 0x1ca   : > { %v1150_v9 = vadd.f32 %v1126_v44, %v2990_v15 }
 0x1cb   : > { %v1717_v23 = vsel %vm1696_vm2, %v1715_v8, %v1716_v0  ;;  %v1486_v62 = vadd.f32 %v1460_v5, %v1318_v14 }
 0x1cc   : > { %v1739_v6 = vmax.f32 %v1672_v57, %v1717_v23 }
 0x1cd   : > { %v1652_v47 = vadd.f32 %v1626_v25, %v1486_v62 }
 0x1ce   : > { %v1747_v60 = vmax.f32 %v1738_v34, %v1739_v6 }
 0x1cf   : > { %v1674_v2 = vadd.f32 %v3029_v35, %v1652_v47 }
 0x1d0   : > { %v1295_v45 = vpop.f32.mrf.mxu2  ;;  %1755 = vxpose.xlu0.b32.cont [6/8] (short) (narrow) %v1747_v60, 8  ;;  %v1469_v27 = vpop.f32.mrf.mxu3 }
 0x1d1   : > { %v1319_v10 = vadd.f32 %v1295_v45, %v1150_v9  ;;  %v1129_v46 = vpop.f32.mrf.mxu1  ;;  %v1632_v3 = vpop.f32.mrf.mxu0  ;;  %v1718_v17 = vrot.slane %v1674_v2, 1 }
 0x1d2   : > { %v1151_v12 = vadd.f32 %v1129_v46, %v3001_v26 }
 0x1d3   : > { %v1487_v1 = vadd.f32 %v1463_v61, %v1319_v10 }
 0x1d5   : > { %v1653_v30 = vadd.f32 %v1629_v36, %v1487_v1 }
 0x1d7   : > { %v1675_v13 = vadd.f32 %v3029_v35, %v1653_v30 }
 0x1d8   : > { %v1298_v48 = vpop.f32.mrf.mxu2 }
 0x1d9   : > { %v1719_v7 = vrot.slane %v1675_v13, 1  ;;  %v1320_v11 = vadd.f32 %v1298_v48, %v1151_v12  ;;  %v1132_v31 = vpop.f32.mrf.mxu1  ;;  %v1635_v20 = vpop.f32.mrf.mxu0 }
 0x1da   : > { %v1152_v51 = vadd.f32 %v1132_v31, %v3013_v63 }
 0x1db   : > { %v1720_v15 = vsel %vm1696_vm2, %v1718_v17, %v1719_v7  ;;  %v1488_v16 = vadd.f32 %v1466_v56, %v1320_v11 }
 0x1dc   : > { %v1740_v18 = vmax.f32 %v1674_v2, %v1720_v15 }
 0x1dd   : > { %v1654_v26 = vadd.f32 %v1632_v3, %v1488_v16 }
 0x1de   : > { %v1748_v49 = vmax.f32 %v1739_v6, %v1740_v18 }
 0x1df   : > { %v1676_v43 = vadd.f32 %v3029_v35, %v1654_v26 }
 0x1e0   : > { %v1301_v50 = vpop.f32.mrf.mxu2  ;;  %1756 = vxpose.xlu0.b32.cont [7/8] (short) (narrow) %v1748_v49, 8 }
 0x1e1   : > { %v1321_v22 = vadd.f32 %v1301_v50, %v1152_v51  ;;  %v1721_v52 = vrot.slane %v1676_v43, 1 }
 0x1e3   : > { %v1489_v24 = vadd.f32 %v1469_v27, %v1321_v22 }
 0x1e5   : > { %v1655_v38 = vadd.f32 %v1635_v20, %v1489_v24 }
 0x1e7   : > { %v1677_v29 = vadd.f32 %v3029_v35, %v1655_v38 }
 0x1e9   : > { %v1722_v21 = vrot.slane %v1677_v29, 1 }
 0x1eb   : > { %v1723_v37 = vsel %vm1696_vm2, %v1721_v52, %v1722_v21 }
 0x1ec   : > { %v1741_v53 = vmax.f32 %v1676_v43, %v1723_v37 }
 0x1ee   : > { %v1749_v63 = vmax.f32 %v1740_v18, %v1741_v53 }
 0x1f0   : > { %1757 = vxpose.xlu0.b32.end [8/8] (short) (narrow) %v1749_v63, 8 }
 0x25c   : > { %v1766_v35 = vpop.trf.xlu0 }
 0x25d   : > { %1783 = vst.msk [vmem:[%s177_s19] sm:$0xff] %vm1782_vm3, %v1766_v35 }
 0x25e   : > { %2292 = shalt.err (!%p2289_p5)
}
 0x25f   : > { %2208 = dma.vmem_to_hbm [thread:$0]  (%p2405_p4), %s1799_s21, 128, %s1801_s23, %s1785_s26  }
 0x260 PF: > { %p2214_p6 = scmp.ge.s32.totalorder %s2343_s17, 2  ;;  %s1812_s6 = sand.u32 1, %s2323_s12  }
 0x261   : > { %s1813_s7 = scalar_lea.sflag [#allocation3], %s1812_s6 }
 0x262   : > { %p2211_p7 = pnand %p2214_p6, %p2412_p8 }
 0x264   : > { %p2212_p9 = pneg %p2211_p7 }
 0x266   : > { %2318 = dma.done.wait (%p2212_p9), %s1813_s7, 128  }
 0x267   : > { %2320 = vsyncadd (%p2212_p9), %s1813_s7, 4294967168  ;;  %s16_s17 = sadd.s32 1, %s2343_s17   ;;  %s3160_s12 = smov %s2327_s13 }
 0x268   : > { %p13_p10 = scmp.ge.s32.totalorder %s16_s17, 4   ;;  %s3161_s13 = smov %s2331_s14 }
 0x269   : > { %s3162_s14 = smov %s2418_s25  ;;  %s3163_s15 = smov %s2339_s16 }
 0x26a   : > { %s3164_s16 = smov %s3166_s20  ;;  %15 = sbr.rel (!%p13_p10) target bundleno = 4 (0x4), region = 81 }
 0x26f   :  { %1819 = vsyncpa [#allocation3], 1 }
 0x270   :  { %1821 = vsyncpa [#allocation3 + $0x1], 1 }

</bundles_post_ra>
